<compile_context>
chip_gen: v6e
topology: v6e:2x2x1
jax: 0.10.0
libtpu: 0.0.40
codegen_flags: <defaults>
</compile_context>

<pallas_src>
import jax
import jax.numpy as jnp
from jax import lax
from jax.experimental import pallas as pl
from jax.experimental.pallas import tpu as pltpu

# ----------------------------- configuration --------------------------------
SRC_VOCAB = 64        # stand-in "BERT" vocabulary
TGT_VOCAB = 128       # target tokenizer vocabulary (multiple of 128 lanes)
EMBED_DIM = 128       # model hidden size
CRF_LOW_RANK = 16
PAD_ID = 0            # target-tokenizer padding_idx (masked like ignore_index=-100)
SRC_PAD_ID = 0        # source pad token id


def _round_up(x, m):
    return (x + m - 1) // m * m


# ------------- Kernel A: tgt_word_prj matmul + masked cross-entropy ---------
def _mle_kernel(x_ref, w_ref, b_ref, lab_ref, logits_ref, part_ref):
    # x: (T, D) bf16, w: (D, V) bf16, b: (1, V) f32, lab: (T, 1) int32
    logits = jnp.dot(x_ref[...], w_ref[...],
                     preferred_element_type=jnp.float32) + b_ref[...]
    logits_ref[...] = logits                                      # CRF emissions

    # masked CE without materializing the full (T, V) log-softmax:
    # pick z at the target column, subtract per-row logsumexp afterwards.
    m = jnp.max(logits, axis=-1, keepdims=True)
    z = logits - m
    lse = jnp.log(jnp.sum(jnp.exp(z), axis=-1, keepdims=True))    # (T, 1)

    labels = lab_ref[...]                                         # (T, 1)
    col = lax.broadcasted_iota(jnp.int32, z.shape, 1)
    tgt_z = jnp.sum(jnp.where(col == labels, z, 0.0), axis=-1, keepdims=True)
    valid = (labels != PAD_ID).astype(jnp.float32)

    loss_val = -jnp.sum((tgt_z - lse) * valid)                    # per-tile partial sum
    cnt_val = jnp.sum(valid)

    # lane-dense (8, 128) partial block: loss at [0,0], count at [0,1]
    sub = lax.broadcasted_iota(jnp.int32, (8, 128), 0)
    lane = lax.broadcasted_iota(jnp.int32, (8, 128), 1)
    part_ref[...] = jnp.where((sub == 0) & (lane == 0), loss_val,
                              jnp.where((sub == 0) & (lane == 1), cnt_val, 0.0))


def mle_projection_ce(x, labels, w, b, *, tile_rows=512):
    n, d = x.shape
    v = w.shape[1]
    tile_rows = min(tile_rows, _round_up(n, 8))
    n_pad = _round_up(n, tile_rows)
    if n_pad != n:  # tail handling: pad rows, label them PAD so they don't count
        x = jnp.pad(x, ((0, n_pad - n), (0, 0)))
        labels = jnp.pad(labels, ((0, n_pad - n), (0, 0)), constant_values=PAD_ID)
    num_tiles = n_pad // tile_rows

    logits, partials = pl.pallas_call(
        _mle_kernel,
        out_shape=(
            jax.ShapeDtypeStruct((n_pad, v), jnp.float32),
            jax.ShapeDtypeStruct((num_tiles, 8, 128), jnp.float32),
        ),
        grid_spec=pltpu.PrefetchScalarGridSpec(
            num_scalar_prefetch=0,
            grid=(num_tiles,),
            in_specs=[
                pl.BlockSpec((tile_rows, d), lambda i: (i, 0)),
                pl.BlockSpec((d, v), lambda i: (0, 0)),
                pl.BlockSpec((1, v), lambda i: (0, 0)),
                pl.BlockSpec((tile_rows, 1), lambda i: (i, 0)),
            ],
            out_specs=[
                pl.BlockSpec((tile_rows, v), lambda i: (i, 0)),
                pl.BlockSpec((None, 8, 128), lambda i: (i, 0, 0)),
            ],
        ),
        compiler_params=pltpu.CompilerParams(dimension_semantics=("parallel",)),
    )(x.astype(jnp.bfloat16), w.astype(jnp.bfloat16), b, labels)

    mle_loss = jnp.sum(partials[:, 0, 0]) / jnp.sum(partials[:, 0, 1])
    return mle_loss, logits[:n]


# --------- Kernel B: CRF log-partition (forward algorithm), batched ---------
def _crf_logz_kernel(em_ref, mask_ref, etr_ref, out_ref):
    # em: (Bt, S, V) f32, mask: (Bt, S) f32, etr: (V, V) f32 = exp(trans - max),
    # out: (Bt, 128) f32.  The global max(trans) is added back in the wrapper.
    bt, s, v = em_ref.shape
    exp_tr = etr_ref[...]                                         # (Vprev, Vcur), in (0, 1]
    mvec = mask_ref[...]                                          # (Bt, S)
    t_iota = lax.broadcasted_iota(jnp.int32, mvec.shape, 1)

    alpha = em_ref[:, pl.ds(0, 1), :].reshape(bt, v)              # (Bt, V)

    def step(t, alpha):
        e_t = em_ref[:, pl.ds(t, 1), :].reshape(bt, v)            # (Bt, V)
        # logsumexp_i(alpha[b,i] + trans[i,j])  ==  m_a + m_tr + log(exp(alpha-m_a) @ exp_tr)
        # (m_tr folded back in the wrapper, mask-weighted) -> MXU matmul per step.
        m_a = jnp.max(alpha, axis=-1, keepdims=True)              # (Bt, 1)
        p = jnp.exp(alpha - m_a)                                  # (Bt, V), <= 1
        acc = jnp.dot(p, exp_tr, preferred_element_type=jnp.float32)   # (Bt, V) on MXU
        new_alpha = m_a + jnp.log(jnp.maximum(acc, 1e-37)) + e_t
        m_t = jnp.sum(jnp.where(t_iota == t, mvec, 0.0),
                      axis=-1, keepdims=True)                     # (Bt, 1)
        return jnp.where(m_t > 0.0, new_alpha, alpha)

    alpha = lax.fori_loop(1, s, step, alpha, unroll=(s <= 32))

    mx = jnp.max(alpha, axis=-1, keepdims=True)
    log_z = mx + jnp.log(jnp.sum(jnp.exp(alpha - mx), axis=-1, keepdims=True))
    out_ref[...] = jnp.broadcast_to(log_z, (bt, 128))             # lane-dense store


def crf_log_partition(emissions, tgt_mask, trans, *, block_b=8):
    bsz, s, v = emissions.shape
    bt = min(block_b, bsz)
    b_pad = _round_up(bsz, bt)
    if b_pad != bsz:  # padded rows are fully masked and sliced away below
        emissions = jnp.pad(emissions, ((0, b_pad - bsz), (0, 0), (0, 0)))
        tgt_mask = jnp.pad(tgt_mask, ((0, b_pad - bsz), (0, 0)))
    nb = b_pad // bt

    # Factor the transition max out of the kernel so the recursion is a pure
    # MXU matmul on exp(trans - m_tr); add it back once per accepted step.
    m_tr = jnp.max(trans)
    exp_trans = jnp.exp(trans - m_tr)

    out = pl.pallas_call(
        _crf_logz_kernel,
        out_shape=jax.ShapeDtypeStruct((nb, bt, 128), jnp.float32),
        grid_spec=pltpu.PrefetchScalarGridSpec(
            num_scalar_prefetch=0,
            grid=(nb,),
            in_specs=[
                pl.BlockSpec((None, bt, s, v), lambda g: (g, 0, 0, 0)),
                pl.BlockSpec((None, bt, s), lambda g: (g, 0, 0)),
                pl.BlockSpec((v, v), lambda g: (0, 0)),
            ],
            out_specs=pl.BlockSpec((None, bt, 128), lambda g: (g, 0, 0)),
        ),
        compiler_params=pltpu.CompilerParams(dimension_semantics=("parallel",)),
    )(emissions.reshape(nb, bt, s, v), tgt_mask.reshape(nb, bt, s), exp_trans)

    log_z = out.reshape(b_pad, 128)[:bsz, 0]                      # log_Z (shifted)
    accepted_steps = jnp.sum(tgt_mask[:, 1:], axis=-1)            # (B,)
    return log_z + m_tr * accepted_steps                          # exact log_Z per sequence


# ------------------------------- glue ----------------------------------------
def init_params(key):
    ks = jax.random.split(key, 4)
    scale = 0.02
    return dict(
        src_embed=scale * jax.random.normal(ks[0], (SRC_VOCAB, EMBED_DIM), jnp.float32),
        proj_w=scale * jax.random.normal(ks[1], (EMBED_DIM, TGT_VOCAB), jnp.float32),
        proj_b=jnp.zeros((1, TGT_VOCAB), jnp.float32),
        crf_e1=scale * jax.random.normal(ks[2], (TGT_VOCAB, CRF_LOW_RANK), jnp.float32),
        crf_e2=scale * jax.random.normal(ks[3], (TGT_VOCAB, CRF_LOW_RANK), jnp.float32),
    )


def content_planner_forward(params, src_input, tgt_input):
    bsz, seqlen = src_input.shape
    # src_mask (as in the PyTorch forward) only feeds BERT's attention;
    # the stand-in encoder below is position-wise, so it is unused here.
    _ = jnp.where(src_input == SRC_PAD_ID, 0.0, 1.0)
    # TODO(synk): pretrained BERT encoder replaced by a deterministic embedding
    # lookup stand-in (no checkpoint / network access in this synthetic kernel).
    src_rep = jnp.take(params["src_embed"], src_input, axis=0)     # (B, S, D)

    x = src_rep.reshape(bsz * seqlen, EMBED_DIM)
    labels = tgt_input.reshape(bsz * seqlen, 1).astype(jnp.int32)
    mle_loss, logits = mle_projection_ce(x, labels, params["proj_w"], params["proj_b"])
    emissions = logits.reshape(bsz, seqlen, TGT_VOCAB)

    trans = params["crf_e1"] @ params["crf_e2"].T                  # (V, V) low-rank transitions
    tgt = tgt_input.astype(jnp.int32)
    tgt_mask = (tgt != PAD_ID).astype(jnp.float32)

    # CRF numerator (gold-path score): cheap gathers in plain JAX.
    emis_gold = jnp.take_along_axis(emissions, tgt[..., None], axis=-1)[..., 0]
    tr_gold = trans[tgt[:, :-1], tgt[:, 1:]]
    num = (jnp.sum(emis_gold * tgt_mask, axis=-1)
           + jnp.sum(tr_gold * tgt_mask[:, 1:], axis=-1))          # (B,)

    # TODO(synk): fairseq DynamicCRF uses a beam-truncated normalizer; the exact
    # forward algorithm is used here (source of DynamicCRF not provided).
    log_z = crf_log_partition(emissions, tgt_mask, trans)          # (B,)
    batch_crf_loss = log_z - num                                   # == -crf_layer(...)
    crf_loss = jnp.sum(batch_crf_loss) / jnp.sum(tgt_mask)
    return mle_loss, crf_loss


def _reference(params, src_input, tgt_input):
    """Pure-JAX reference for correctness checking."""
    src_rep = jnp.take(params["src_embed"], src_input, axis=0)
    logits = src_rep @ params["proj_w"] + params["proj_b"][0]
    logp = jax.nn.log_softmax(logits, axis=-1)
    valid = (tgt_input != PAD_ID).astype(jnp.float32)
    tgt_logp = jnp.take_along_axis(logp, tgt_input[..., None], axis=-1)[..., 0]
    mle_loss = -jnp.sum(tgt_logp * valid) / jnp.sum(valid)

    trans = params["crf_e1"] @ params["crf_e2"].T

    def one(em, y):
        mask = (y != PAD_ID).astype(jnp.float32)
        emis = jnp.take_along_axis(em, y[:, None], axis=-1)[:, 0]
        tr = trans[y[:-1], y[1:]]
        num = jnp.sum(emis * mask) + jnp.sum(tr * mask[1:])

        def step(alpha, inp):
            e_t, m_t = inp
            new = jax.scipy.special.logsumexp(alpha[:, None] + trans, axis=0) + e_t
            return jnp.where(m_t > 0, new, alpha), None

        alpha, _ = lax.scan(step, em[0], (em[1:], mask[1:]))
        return -(num - jax.scipy.special.logsumexp(alpha))

    batch = jax.vmap(one)(logits, tgt_input)
    crf_loss = jnp.sum(batch) / jnp.sum(valid)
    return mle_loss, crf_loss


if __name__ == "__main__":
    key = jax.random.PRNGKey(0)
    kp, ks, kt = jax.random.split(key, 3)
    params = init_params(kp)

    bsz, seqlen = 2, 8
    src_input = jax.random.randint(ks, (bsz, seqlen), 1, SRC_VOCAB, dtype=jnp.int32)
    tgt_input = jax.random.randint(kt, (bsz, seqlen), 1, TGT_VOCAB, dtype=jnp.int32)
    # pad the tails like real batches (first position always non-pad)
    src_input = src_input.at[0, 7:].set(SRC_PAD_ID)
    tgt_input = tgt_input.at[0, 6:].set(PAD_ID)
    tgt_input = tgt_input.at[1, 7:].set(PAD_ID)

    fwd = jax.jit(content_planner_forward)
    mle_loss, crf_loss = fwd(params, src_input, tgt_input)
    jax.block_until_ready((mle_loss, crf_loss))

    ref_mle, ref_crf = _reference(params, src_input, tgt_input)
    assert jnp.allclose(mle_loss, ref_mle, rtol=2e-2, atol=5e-3), (mle_loss, ref_mle)
    assert jnp.allclose(crf_loss, ref_crf, rtol=2e-2, atol=5e-3), (crf_loss, ref_crf)

    print("KERNEL_OK")
</pallas_src>

<mosaic_0001>
module attributes {stable_mosaic.version = 11 : i64} {
  func.func @_mle_kernel(%arg0: i32, %arg1: memref<16x128xbf16, #tpu.memory_space<vmem>>, %arg2: memref<128x128xbf16, #tpu.memory_space<vmem>>, %arg3: memref<1x128xf32, #tpu.memory_space<vmem>>, %arg4: memref<16x1xi32, #tpu.memory_space<vmem>>, %arg5: memref<16x128xf32, #tpu.memory_space<vmem>>, %arg6: memref<1x8x128xf32, #tpu.memory_space<vmem>>) attributes {dimension_semantics = [#tpu.dimension_semantics<parallel>], iteration_bounds = array<i64: 1>, scalar_prefetch = 0 : i64, scratch_operands = 0 : i64, tpu.core_type = #tpu.core_type<tc>, window_params = [{transform_indices = @transform_0, window_bounds = array<i64: 16, 128>}, {pipeline_mode = #tpu.pipeline_mode<synchronous>, transform_indices = @transform_1, window_bounds = array<i64: 128, 128>}, {pipeline_mode = #tpu.pipeline_mode<synchronous>, transform_indices = @transform_2, window_bounds = array<i64: 1, 128>}, {transform_indices = @transform_3, window_bounds = array<i64: 16, 1>}, {transform_indices = @transform_4, window_bounds = array<i64: 16, 128>}, {transform_indices = @transform_5, window_bounds = array<i64: 1, 8, 128>}]} {
    %c0 = arith.constant 0 : index
    %c0_0 = arith.constant 0 : index
    %0 = vector.load %arg1[%c0, %c0_0] : memref<16x128xbf16, #tpu.memory_space<vmem>>, vector<16x128xbf16>
    %c0_1 = arith.constant 0 : index
    %c0_2 = arith.constant 0 : index
    %1 = vector.load %arg2[%c0_1, %c0_2] : memref<128x128xbf16, #tpu.memory_space<vmem>>, vector<128x128xbf16>
    %cst = arith.constant dense<0.000000e+00> : vector<16x128xf32>
    %2 = tpu.matmul %0, %1, %cst {dimension_numbers = #tpu.dot_dimension_numbers<[1], [0], [0], [1], [0, 0, 1, 1], [], []>} : vector<16x128xbf16>, vector<128x128xbf16>, vector<16x128xf32> -> vector<16x128xf32>
    %c0_3 = arith.constant 0 : index
    %c0_4 = arith.constant 0 : index
    %3 = vector.load %arg3[%c0_3, %c0_4] : memref<1x128xf32, #tpu.memory_space<vmem>>, vector<1x128xf32>
    %4 = vector.broadcast %3 : vector<1x128xf32> to vector<16x128xf32>
    %5 = arith.addf %2, %4 : vector<16x128xf32>
    %c0_5 = arith.constant 0 : index
    %c0_6 = arith.constant 0 : index
    %6 = vector.load %arg5[%c0_5, %c0_6] : memref<16x128xf32, #tpu.memory_space<vmem>>, vector<16x128xf32>
    tpu.vector_store %arg5[%c0_5, %c0_6], %5 {strides = array<i32>} : memref<16x128xf32, #tpu.memory_space<vmem>>, vector<16x128xf32>,
    %cst_7 = arith.constant dense<0xFF800000> : vector<16xf32>
    %7 = vector.multi_reduction <maximumf>, %5, %cst_7 [1] : vector<16x128xf32> to vector<16xf32>
    %8 = vector.shape_cast %7 : vector<16xf32> to vector<16x1xf32>
    %9 = vector.broadcast %8 : vector<16x1xf32> to vector<16x128xf32>
    %10 = arith.subf %5, %9 : vector<16x128xf32>
    %11 = math.exp %10 : vector<16x128xf32>
    %cst_8 = arith.constant dense<0.000000e+00> : vector<16xf32>
    %12 = vector.multi_reduction <add>, %11, %cst_8 [1] : vector<16x128xf32> to vector<16xf32>
    %13 = vector.shape_cast %12 : vector<16xf32> to vector<16x1xf32>
    %14 = math.log %13 : vector<16x1xf32>
    %c0_9 = arith.constant 0 : index
    %c0_10 = arith.constant 0 : index
    %15 = vector.load %arg4[%c0_9, %c0_10] : memref<16x1xi32, #tpu.memory_space<vmem>>, vector<16x1xi32>
    %16 = tpu.iota {dimensions = array<i32: 1>} : vector<16x128xi32>
    %17 = vector.broadcast %15 : vector<16x1xi32> to vector<16x128xi32>
    %18 = arith.cmpi eq, %16, %17 : vector<16x128xi32>
    %cst_11 = arith.constant 0.000000e+00 : f32
    %19 = vector.broadcast %cst_11 : f32 to vector<16x128xf32>
    %20 = arith.select %18, %10, %19 : vector<16x128xi1>, vector<16x128xf32>
    %cst_12 = arith.constant dense<0.000000e+00> : vector<16xf32>
    %21 = vector.multi_reduction <add>, %20, %cst_12 [1] : vector<16x128xf32> to vector<16xf32>
    %22 = vector.shape_cast %21 : vector<16xf32> to vector<16x1xf32>
    %c0_i32 = arith.constant 0 : i32
    %23 = vector.broadcast %c0_i32 : i32 to vector<16x1xi32>
    %24 = arith.cmpi ne, %15, %23 : vector<16x1xi32>
    %25 = arith.extui %24 : vector<16x1xi1> to vector<16x1xi32>
    %26 = arith.sitofp %25 : vector<16x1xi32> to vector<16x1xf32>
    %27 = arith.subf %22, %14 : vector<16x1xf32>
    %28 = arith.mulf %27, %26 : vector<16x1xf32>
    %29 = vector.shape_cast %28 : vector<16x1xf32> to vector<1x16x1xf32>
    %cst_13 = arith.constant dense<0.000000e+00> : vector<1xf32>
    %30 = vector.multi_reduction <add>, %29, %cst_13 [1, 2] : vector<1x16x1xf32> to vector<1xf32>
    %31 = vector.shape_cast %30 : vector<1xf32> to vector<1x1x1xf32>
    %32 = vector.extract %31[0, 0, 0] : f32 from vector<1x1x1xf32>
    %cst_14 = arith.constant 0.000000e+00 : f32
    %33 = arith.subf %cst_14, %32 : f32
    %34 = vector.shape_cast %26 : vector<16x1xf32> to vector<1x16x1xf32>
    %cst_15 = arith.constant dense<0.000000e+00> : vector<1xf32>
    %35 = vector.multi_reduction <add>, %34, %cst_15 [1, 2] : vector<1x16x1xf32> to vector<1xf32>
    %36 = vector.shape_cast %35 : vector<1xf32> to vector<1x1x1xf32>
    %37 = vector.extract %36[0, 0, 0] : f32 from vector<1x1x1xf32>
    %38 = tpu.iota {dimensions = array<i32: 0>} : vector<8x128xi32>
    %39 = tpu.iota {dimensions = array<i32: 1>} : vector<8x128xi32>
    %c0_i32_16 = arith.constant 0 : i32
    %40 = vector.broadcast %c0_i32_16 : i32 to vector<8x128xi32>
    %41 = arith.cmpi eq, %38, %40 : vector<8x128xi32>
    %c0_i32_17 = arith.constant 0 : i32
    %42 = vector.broadcast %c0_i32_17 : i32 to vector<8x128xi32>
    %43 = arith.cmpi eq, %39, %42 : vector<8x128xi32>
    %44 = arith.andi %41, %43 : vector<8x128xi1>
    %c0_i32_18 = arith.constant 0 : i32
    %45 = vector.broadcast %c0_i32_18 : i32 to vector<8x128xi32>
    %46 = arith.cmpi eq, %38, %45 : vector<8x128xi32>
    %c1_i32 = arith.constant 1 : i32
    %47 = vector.broadcast %c1_i32 : i32 to vector<8x128xi32>
    %48 = arith.cmpi eq, %39, %47 : vector<8x128xi32>
    %49 = arith.andi %46, %48 : vector<8x128xi1>
    %cst_19 = arith.constant 0.000000e+00 : f32
    %50 = vector.broadcast %37 : f32 to vector<8x128xf32>
    %51 = vector.broadcast %cst_19 : f32 to vector<8x128xf32>
    %52 = arith.select %49, %50, %51 : vector<8x128xi1>, vector<8x128xf32>
    %53 = vector.broadcast %33 : f32 to vector<8x128xf32>
    %54 = arith.select %44, %53, %52 : vector<8x128xi1>, vector<8x128xf32>
    %c0_20 = arith.constant 0 : index
    %c0_21 = arith.constant 0 : index
    %c0_22 = arith.constant 0 : index
    %55 = vector.load %arg6[%c0_20, %c0_21, %c0_22] : memref<1x8x128xf32, #tpu.memory_space<vmem>>, vector<1x8x128xf32>
    %56 = vector.shape_cast %55 : vector<1x8x128xf32> to vector<8x128xf32>
    %57 = vector.shape_cast %54 : vector<8x128xf32> to vector<1x8x128xf32>
    tpu.vector_store %arg6[%c0_20, %c0_21, %c0_22], %57 {strides = array<i32>} : memref<1x8x128xf32, #tpu.memory_space<vmem>>, vector<1x8x128xf32>,
    return
  }
  func.func @transform_0(%arg0: i32) -> (i32, i32) {
    %c0_i32 = arith.constant 0 : i32
    %c0_i32_0 = arith.constant 0 : i32
    return %arg0, %c0_i32 : i32, i32
  }
  func.func @transform_1(%arg0: i32) -> (i32, i32) {
    %c0_i32 = arith.constant 0 : i32
    %c0_i32_0 = arith.constant 0 : i32
    %c0_i32_1 = arith.constant 0 : i32
    return %c0_i32, %c0_i32_0 : i32, i32
  }
  func.func @transform_2(%arg0: i32) -> (i32, i32) {
    %c0_i32 = arith.constant 0 : i32
    %c0_i32_0 = arith.constant 0 : i32
    %c0_i32_1 = arith.constant 0 : i32
    return %c0_i32, %c0_i32_0 : i32, i32
  }
  func.func @transform_3(%arg0: i32) -> (i32, i32) {
    %c0_i32 = arith.constant 0 : i32
    %c0_i32_0 = arith.constant 0 : i32
    return %arg0, %c0_i32 : i32, i32
  }
  func.func @transform_4(%arg0: i32) -> (i32, i32) {
    %c0_i32 = arith.constant 0 : i32
    %c0_i32_0 = arith.constant 0 : i32
    return %arg0, %c0_i32 : i32, i32
  }
  func.func @transform_5(%arg0: i32) -> (i32, i32, i32) {
    %c0_i32 = arith.constant 0 : i32
    %c0_i32_0 = arith.constant 0 : i32
    %c0_i32_1 = arith.constant 0 : i32
    return %arg0, %c0_i32, %c0_i32_0 : i32, i32, i32
  }
}

module attributes {stable_mosaic.version = 11 : i64} {
  func.func @_crf_logz_kernel(%arg0: i32, %arg1: memref<1x2x8x128xf32, #tpu.memory_space<vmem>>, %arg2: memref<1x2x8xf32, #tpu.memory_space<vmem>>, %arg3: memref<128x128xf32, #tpu.memory_space<vmem>>, %arg4: memref<1x2x128xf32, #tpu.memory_space<vmem>>) attributes {dimension_semantics = [#tpu.dimension_semantics<parallel>], iteration_bounds = array<i64: 1>, scalar_prefetch = 0 : i64, scratch_operands = 0 : i64, tpu.core_type = #tpu.core_type<tc>, window_params = [{transform_indices = @transform_0, window_bounds = array<i64: 1, 2, 8, 128>}, {transform_indices = @transform_1, window_bounds = array<i64: 1, 2, 8>}, {pipeline_mode = #tpu.pipeline_mode<synchronous>, transform_indices = @transform_2, window_bounds = array<i64: 128, 128>}, {transform_indices = @transform_3, window_bounds = array<i64: 1, 2, 128>}]} {
    %c0 = arith.constant 0 : index
    %c0_0 = arith.constant 0 : index
    %0 = vector.load %arg3[%c0, %c0_0] : memref<128x128xf32, #tpu.memory_space<vmem>>, vector<128x128xf32>
    %c0_1 = arith.constant 0 : index
    %c0_2 = arith.constant 0 : index
    %c0_3 = arith.constant 0 : index
    %1 = vector.load %arg2[%c0_1, %c0_2, %c0_3] : memref<1x2x8xf32, #tpu.memory_space<vmem>>, vector<1x2x8xf32>
    %2 = vector.shape_cast %1 : vector<1x2x8xf32> to vector<2x8xf32>
    %3 = tpu.iota {dimensions = array<i32: 1>} : vector<2x8xi32>
    %c0_4 = arith.constant 0 : index
    %c0_5 = arith.constant 0 : index
    %c0_6 = arith.constant 0 : index
    %c0_7 = arith.constant 0 : index
    %4 = vector.load %arg1[%c0_4, %c0_5, %c0_6, %c0_7] : memref<1x2x8x128xf32, #tpu.memory_space<vmem>>, vector<1x2x1x128xf32>
    %5 = vector.shape_cast %4 : vector<1x2x1x128xf32> to vector<2x1x128xf32>
    %6 = vector.shape_cast %5 : vector<2x1x128xf32> to vector<2x128xf32>
    %c1_i32 = arith.constant 1 : i32
    %c0_8 = arith.constant 0 : index
    %c0_9 = arith.constant 0 : index
    %7 = arith.index_cast %c1_i32 : i32 to index
    %c0_10 = arith.constant 0 : index
    %8 = vector.load %arg1[%c0_8, %c0_9, %7, %c0_10] : memref<1x2x8x128xf32, #tpu.memory_space<vmem>>, vector<1x2x1x128xf32>
    %9 = vector.shape_cast %8 : vector<1x2x1x128xf32> to vector<2x1x128xf32>
    %10 = vector.shape_cast %9 : vector<2x1x128xf32> to vector<2x128xf32>
    %cst = arith.constant dense<0xFF800000> : vector<2xf32>
    %11 = vector.multi_reduction <maximumf>, %6, %cst [1] : vector<2x128xf32> to vector<2xf32>
    %12 = vector.shape_cast %11 : vector<2xf32> to vector<2x1xf32>
    %13 = vector.broadcast %12 : vector<2x1xf32> to vector<2x128xf32>
    %14 = arith.subf %6, %13 : vector<2x128xf32>
    %15 = math.exp %14 : vector<2x128xf32>
    %cst_11 = arith.constant dense<0.000000e+00> : vector<2x128xf32>
    %16 = tpu.matmul %15, %0, %cst_11 {dimension_numbers = #tpu.dot_dimension_numbers<[1], [0], [0], [1], [0, 0, 1, 1], [], []>} : vector<2x128xf32>, vector<128x128xf32>, vector<2x128xf32> -> vector<2x128xf32>
    %cst_12 = arith.constant 9.99999991E-38 : f32
    %17 = vector.broadcast %cst_12 : f32 to vector<2x128xf32>
    %18 = arith.maximumf %16, %17 : vector<2x128xf32>
    %19 = math.log %18 : vector<2x128xf32>
    %20 = vector.broadcast %12 : vector<2x1xf32> to vector<2x128xf32>
    %21 = arith.addf %20, %19 : vector<2x128xf32>
    %22 = arith.addf %21, %10 : vector<2x128xf32>
    %23 = vector.broadcast %c1_i32 : i32 to vector<2x8xi32>
    %24 = arith.cmpi eq, %3, %23 : vector<2x8xi32>
    %cst_13 = arith.constant 0.000000e+00 : f32
    %25 = vector.broadcast %cst_13 : f32 to vector<2x8xf32>
    %26 = arith.select %24, %2, %25 : vector<2x8xi1>, vector<2x8xf32>
    %cst_14 = arith.constant dense<0.000000e+00> : vector<2xf32>
    %27 = vector.multi_reduction <add>, %26, %cst_14 [1] : vector<2x8xf32> to vector<2xf32>
    %28 = vector.shape_cast %27 : vector<2xf32> to vector<2x1xf32>
    %cst_15 = arith.constant 0.000000e+00 : f32
    %29 = vector.broadcast %cst_15 : f32 to vector<2x1xf32>
    %30 = arith.cmpf ogt, %28, %29 : vector<2x1xf32>
    %31 = vector.shape_cast %30 : vector<2x1xi1> to vector<2x1xi1>
    %32 = vector.broadcast %31 : vector<2x1xi1> to vector<2x128xi1>
    %33 = arith.select %32, %22, %6 : vector<2x128xi1>, vector<2x128xf32>
    %c2_i32 = arith.constant 2 : i32
    %c0_16 = arith.constant 0 : index
    %c0_17 = arith.constant 0 : index
    %34 = arith.index_cast %c2_i32 : i32 to index
    %c0_18 = arith.constant 0 : index
    %35 = vector.load %arg1[%c0_16, %c0_17, %34, %c0_18] : memref<1x2x8x128xf32, #tpu.memory_space<vmem>>, vector<1x2x1x128xf32>
    %36 = vector.shape_cast %35 : vector<1x2x1x128xf32> to vector<2x1x128xf32>
    %37 = vector.shape_cast %36 : vector<2x1x128xf32> to vector<2x128xf32>
    %cst_19 = arith.constant dense<0xFF800000> : vector<2xf32>
    %38 = vector.multi_reduction <maximumf>, %33, %cst_19 [1] : vector<2x128xf32> to vector<2xf32>
    %39 = vector.shape_cast %38 : vector<2xf32> to vector<2x1xf32>
    %40 = vector.broadcast %39 : vector<2x1xf32> to vector<2x128xf32>
    %41 = arith.subf %33, %40 : vector<2x128xf32>
    %42 = math.exp %41 : vector<2x128xf32>
    %cst_20 = arith.constant dense<0.000000e+00> : vector<2x128xf32>
    %43 = tpu.matmul %42, %0, %cst_20 {dimension_numbers = #tpu.dot_dimension_numbers<[1], [0], [0], [1], [0, 0, 1, 1], [], []>} : vector<2x128xf32>, vector<128x128xf32>, vector<2x128xf32> -> vector<2x128xf32>
    %cst_21 = arith.constant 9.99999991E-38 : f32
    %44 = vector.broadcast %cst_21 : f32 to vector<2x128xf32>
    %45 = arith.maximumf %43, %44 : vector<2x128xf32>
    %46 = math.log %45 : vector<2x128xf32>
    %47 = vector.broadcast %39 : vector<2x1xf32> to vector<2x128xf32>
    %48 = arith.addf %47, %46 : vector<2x128xf32>
    %49 = arith.addf %48, %37 : vector<2x128xf32>
    %50 = vector.broadcast %c2_i32 : i32 to vector<2x8xi32>
    %51 = arith.cmpi eq, %3, %50 : vector<2x8xi32>
    %cst_22 = arith.constant 0.000000e+00 : f32
    %52 = vector.broadcast %cst_22 : f32 to vector<2x8xf32>
    %53 = arith.select %51, %2, %52 : vector<2x8xi1>, vector<2x8xf32>
    %cst_23 = arith.constant dense<0.000000e+00> : vector<2xf32>
    %54 = vector.multi_reduction <add>, %53, %cst_23 [1] : vector<2x8xf32> to vector<2xf32>
    %55 = vector.shape_cast %54 : vector<2xf32> to vector<2x1xf32>
    %cst_24 = arith.constant 0.000000e+00 : f32
    %56 = vector.broadcast %cst_24 : f32 to vector<2x1xf32>
    %57 = arith.cmpf ogt, %55, %56 : vector<2x1xf32>
    %58 = vector.shape_cast %57 : vector<2x1xi1> to vector<2x1xi1>
    %59 = vector.broadcast %58 : vector<2x1xi1> to vector<2x128xi1>
    %60 = arith.select %59, %49, %33 : vector<2x128xi1>, vector<2x128xf32>
    %c3_i32 = arith.constant 3 : i32
    %c0_25 = arith.constant 0 : index
    %c0_26 = arith.constant 0 : index
    %61 = arith.index_cast %c3_i32 : i32 to index
    %c0_27 = arith.constant 0 : index
    %62 = vector.load %arg1[%c0_25, %c0_26, %61, %c0_27] : memref<1x2x8x128xf32, #tpu.memory_space<vmem>>, vector<1x2x1x128xf32>
    %63 = vector.shape_cast %62 : vector<1x2x1x128xf32> to vector<2x1x128xf32>
    %64 = vector.shape_cast %63 : vector<2x1x128xf32> to vector<2x128xf32>
    %cst_28 = arith.constant dense<0xFF800000> : vector<2xf32>
    %65 = vector.multi_reduction <maximumf>, %60, %cst_28 [1] : vector<2x128xf32> to vector<2xf32>
    %66 = vector.shape_cast %65 : vector<2xf32> to vector<2x1xf32>
    %67 = vector.broadcast %66 : vector<2x1xf32> to vector<2x128xf32>
    %68 = arith.subf %60, %67 : vector<2x128xf32>
    %69 = math.exp %68 : vector<2x128xf32>
    %cst_29 = arith.constant dense<0.000000e+00> : vector<2x128xf32>
    %70 = tpu.matmul %69, %0, %cst_29 {dimension_numbers = #tpu.dot_dimension_numbers<[1], [0], [0], [1], [0, 0, 1, 1], [], []>} : vector<2x128xf32>, vector<128x128xf32>, vector<2x128xf32> -> vector<2x128xf32>
    %cst_30 = arith.constant 9.99999991E-38 : f32
    %71 = vector.broadcast %cst_30 : f32 to vector<2x128xf32>
    %72 = arith.maximumf %70, %71 : vector<2x128xf32>
    %73 = math.log %72 : vector<2x128xf32>
    %74 = vector.broadcast %66 : vector<2x1xf32> to vector<2x128xf32>
    %75 = arith.addf %74, %73 : vector<2x128xf32>
    %76 = arith.addf %75, %64 : vector<2x128xf32>
    %77 = vector.broadcast %c3_i32 : i32 to vector<2x8xi32>
    %78 = arith.cmpi eq, %3, %77 : vector<2x8xi32>
    %cst_31 = arith.constant 0.000000e+00 : f32
    %79 = vector.broadcast %cst_31 : f32 to vector<2x8xf32>
    %80 = arith.select %78, %2, %79 : vector<2x8xi1>, vector<2x8xf32>
    %cst_32 = arith.constant dense<0.000000e+00> : vector<2xf32>
    %81 = vector.multi_reduction <add>, %80, %cst_32 [1] : vector<2x8xf32> to vector<2xf32>
    %82 = vector.shape_cast %81 : vector<2xf32> to vector<2x1xf32>
    %cst_33 = arith.constant 0.000000e+00 : f32
    %83 = vector.broadcast %cst_33 : f32 to vector<2x1xf32>
    %84 = arith.cmpf ogt, %82, %83 : vector<2x1xf32>
    %85 = vector.shape_cast %84 : vector<2x1xi1> to vector<2x1xi1>
    %86 = vector.broadcast %85 : vector<2x1xi1> to vector<2x128xi1>
    %87 = arith.select %86, %76, %60 : vector<2x128xi1>, vector<2x128xf32>
    %c4_i32 = arith.constant 4 : i32
    %c0_34 = arith.constant 0 : index
    %c0_35 = arith.constant 0 : index
    %88 = arith.index_cast %c4_i32 : i32 to index
    %c0_36 = arith.constant 0 : index
    %89 = vector.load %arg1[%c0_34, %c0_35, %88, %c0_36] : memref<1x2x8x128xf32, #tpu.memory_space<vmem>>, vector<1x2x1x128xf32>
    %90 = vector.shape_cast %89 : vector<1x2x1x128xf32> to vector<2x1x128xf32>
    %91 = vector.shape_cast %90 : vector<2x1x128xf32> to vector<2x128xf32>
    %cst_37 = arith.constant dense<0xFF800000> : vector<2xf32>
    %92 = vector.multi_reduction <maximumf>, %87, %cst_37 [1] : vector<2x128xf32> to vector<2xf32>
    %93 = vector.shape_cast %92 : vector<2xf32> to vector<2x1xf32>
    %94 = vector.broadcast %93 : vector<2x1xf32> to vector<2x128xf32>
    %95 = arith.subf %87, %94 : vector<2x128xf32>
    %96 = math.exp %95 : vector<2x128xf32>
    %cst_38 = arith.constant dense<0.000000e+00> : vector<2x128xf32>
    %97 = tpu.matmul %96, %0, %cst_38 {dimension_numbers = #tpu.dot_dimension_numbers<[1], [0], [0], [1], [0, 0, 1, 1], [], []>} : vector<2x128xf32>, vector<128x128xf32>, vector<2x128xf32> -> vector<2x128xf32>
    %cst_39 = arith.constant 9.99999991E-38 : f32
    %98 = vector.broadcast %cst_39 : f32 to vector<2x128xf32>
    %99 = arith.maximumf %97, %98 : vector<2x128xf32>
    %100 = math.log %99 : vector<2x128xf32>
    %101 = vector.broadcast %93 : vector<2x1xf32> to vector<2x128xf32>
    %102 = arith.addf %101, %100 : vector<2x128xf32>
    %103 = arith.addf %102, %91 : vector<2x128xf32>
    %104 = vector.broadcast %c4_i32 : i32 to vector<2x8xi32>
    %105 = arith.cmpi eq, %3, %104 : vector<2x8xi32>
    %cst_40 = arith.constant 0.000000e+00 : f32
    %106 = vector.broadcast %cst_40 : f32 to vector<2x8xf32>
    %107 = arith.select %105, %2, %106 : vector<2x8xi1>, vector<2x8xf32>
    %cst_41 = arith.constant dense<0.000000e+00> : vector<2xf32>
    %108 = vector.multi_reduction <add>, %107, %cst_41 [1] : vector<2x8xf32> to vector<2xf32>
    %109 = vector.shape_cast %108 : vector<2xf32> to vector<2x1xf32>
    %cst_42 = arith.constant 0.000000e+00 : f32
    %110 = vector.broadcast %cst_42 : f32 to vector<2x1xf32>
    %111 = arith.cmpf ogt, %109, %110 : vector<2x1xf32>
    %112 = vector.shape_cast %111 : vector<2x1xi1> to vector<2x1xi1>
    %113 = vector.broadcast %112 : vector<2x1xi1> to vector<2x128xi1>
    %114 = arith.select %113, %103, %87 : vector<2x128xi1>, vector<2x128xf32>
    %c5_i32 = arith.constant 5 : i32
    %c0_43 = arith.constant 0 : index
    %c0_44 = arith.constant 0 : index
    %115 = arith.index_cast %c5_i32 : i32 to index
    %c0_45 = arith.constant 0 : index
    %116 = vector.load %arg1[%c0_43, %c0_44, %115, %c0_45] : memref<1x2x8x128xf32, #tpu.memory_space<vmem>>, vector<1x2x1x128xf32>
    %117 = vector.shape_cast %116 : vector<1x2x1x128xf32> to vector<2x1x128xf32>
    %118 = vector.shape_cast %117 : vector<2x1x128xf32> to vector<2x128xf32>
    %cst_46 = arith.constant dense<0xFF800000> : vector<2xf32>
    %119 = vector.multi_reduction <maximumf>, %114, %cst_46 [1] : vector<2x128xf32> to vector<2xf32>
    %120 = vector.shape_cast %119 : vector<2xf32> to vector<2x1xf32>
    %121 = vector.broadcast %120 : vector<2x1xf32> to vector<2x128xf32>
    %122 = arith.subf %114, %121 : vector<2x128xf32>
    %123 = math.exp %122 : vector<2x128xf32>
    %cst_47 = arith.constant dense<0.000000e+00> : vector<2x128xf32>
    %124 = tpu.matmul %123, %0, %cst_47 {dimension_numbers = #tpu.dot_dimension_numbers<[1], [0], [0], [1], [0, 0, 1, 1], [], []>} : vector<2x128xf32>, vector<128x128xf32>, vector<2x128xf32> -> vector<2x128xf32>
    %cst_48 = arith.constant 9.99999991E-38 : f32
    %125 = vector.broadcast %cst_48 : f32 to vector<2x128xf32>
    %126 = arith.maximumf %124, %125 : vector<2x128xf32>
    %127 = math.log %126 : vector<2x128xf32>
    %128 = vector.broadcast %120 : vector<2x1xf32> to vector<2x128xf32>
    %129 = arith.addf %128, %127 : vector<2x128xf32>
    %130 = arith.addf %129, %118 : vector<2x128xf32>
    %131 = vector.broadcast %c5_i32 : i32 to vector<2x8xi32>
    %132 = arith.cmpi eq, %3, %131 : vector<2x8xi32>
    %cst_49 = arith.constant 0.000000e+00 : f32
    %133 = vector.broadcast %cst_49 : f32 to vector<2x8xf32>
    %134 = arith.select %132, %2, %133 : vector<2x8xi1>, vector<2x8xf32>
    %cst_50 = arith.constant dense<0.000000e+00> : vector<2xf32>
    %135 = vector.multi_reduction <add>, %134, %cst_50 [1] : vector<2x8xf32> to vector<2xf32>
    %136 = vector.shape_cast %135 : vector<2xf32> to vector<2x1xf32>
    %cst_51 = arith.constant 0.000000e+00 : f32
    %137 = vector.broadcast %cst_51 : f32 to vector<2x1xf32>
    %138 = arith.cmpf ogt, %136, %137 : vector<2x1xf32>
    %139 = vector.shape_cast %138 : vector<2x1xi1> to vector<2x1xi1>
    %140 = vector.broadcast %139 : vector<2x1xi1> to vector<2x128xi1>
    %141 = arith.select %140, %130, %114 : vector<2x128xi1>, vector<2x128xf32>
    %c6_i32 = arith.constant 6 : i32
    %c0_52 = arith.constant 0 : index
    %c0_53 = arith.constant 0 : index
    %142 = arith.index_cast %c6_i32 : i32 to index
    %c0_54 = arith.constant 0 : index
    %143 = vector.load %arg1[%c0_52, %c0_53, %142, %c0_54] : memref<1x2x8x128xf32, #tpu.memory_space<vmem>>, vector<1x2x1x128xf32>
    %144 = vector.shape_cast %143 : vector<1x2x1x128xf32> to vector<2x1x128xf32>
    %145 = vector.shape_cast %144 : vector<2x1x128xf32> to vector<2x128xf32>
    %cst_55 = arith.constant dense<0xFF800000> : vector<2xf32>
    %146 = vector.multi_reduction <maximumf>, %141, %cst_55 [1] : vector<2x128xf32> to vector<2xf32>
    %147 = vector.shape_cast %146 : vector<2xf32> to vector<2x1xf32>
    %148 = vector.broadcast %147 : vector<2x1xf32> to vector<2x128xf32>
    %149 = arith.subf %141, %148 : vector<2x128xf32>
    %150 = math.exp %149 : vector<2x128xf32>
    %cst_56 = arith.constant dense<0.000000e+00> : vector<2x128xf32>
    %151 = tpu.matmul %150, %0, %cst_56 {dimension_numbers = #tpu.dot_dimension_numbers<[1], [0], [0], [1], [0, 0, 1, 1], [], []>} : vector<2x128xf32>, vector<128x128xf32>, vector<2x128xf32> -> vector<2x128xf32>
    %cst_57 = arith.constant 9.99999991E-38 : f32
    %152 = vector.broadcast %cst_57 : f32 to vector<2x128xf32>
    %153 = arith.maximumf %151, %152 : vector<2x128xf32>
    %154 = math.log %153 : vector<2x128xf32>
    %155 = vector.broadcast %147 : vector<2x1xf32> to vector<2x128xf32>
    %156 = arith.addf %155, %154 : vector<2x128xf32>
    %157 = arith.addf %156, %145 : vector<2x128xf32>
    %158 = vector.broadcast %c6_i32 : i32 to vector<2x8xi32>
    %159 = arith.cmpi eq, %3, %158 : vector<2x8xi32>
    %cst_58 = arith.constant 0.000000e+00 : f32
    %160 = vector.broadcast %cst_58 : f32 to vector<2x8xf32>
    %161 = arith.select %159, %2, %160 : vector<2x8xi1>, vector<2x8xf32>
    %cst_59 = arith.constant dense<0.000000e+00> : vector<2xf32>
    %162 = vector.multi_reduction <add>, %161, %cst_59 [1] : vector<2x8xf32> to vector<2xf32>
    %163 = vector.shape_cast %162 : vector<2xf32> to vector<2x1xf32>
    %cst_60 = arith.constant 0.000000e+00 : f32
    %164 = vector.broadcast %cst_60 : f32 to vector<2x1xf32>
    %165 = arith.cmpf ogt, %163, %164 : vector<2x1xf32>
    %166 = vector.shape_cast %165 : vector<2x1xi1> to vector<2x1xi1>
    %167 = vector.broadcast %166 : vector<2x1xi1> to vector<2x128xi1>
    %168 = arith.select %167, %157, %141 : vector<2x128xi1>, vector<2x128xf32>
    %c7_i32 = arith.constant 7 : i32
    %c0_61 = arith.constant 0 : index
    %c0_62 = arith.constant 0 : index
    %169 = arith.index_cast %c7_i32 : i32 to index
    %c0_63 = arith.constant 0 : index
    %170 = vector.load %arg1[%c0_61, %c0_62, %169, %c0_63] : memref<1x2x8x128xf32, #tpu.memory_space<vmem>>, vector<1x2x1x128xf32>
    %171 = vector.shape_cast %170 : vector<1x2x1x128xf32> to vector<2x1x128xf32>
    %172 = vector.shape_cast %171 : vector<2x1x128xf32> to vector<2x128xf32>
    %cst_64 = arith.constant dense<0xFF800000> : vector<2xf32>
    %173 = vector.multi_reduction <maximumf>, %168, %cst_64 [1] : vector<2x128xf32> to vector<2xf32>
    %174 = vector.shape_cast %173 : vector<2xf32> to vector<2x1xf32>
    %175 = vector.broadcast %174 : vector<2x1xf32> to vector<2x128xf32>
    %176 = arith.subf %168, %175 : vector<2x128xf32>
    %177 = math.exp %176 : vector<2x128xf32>
    %cst_65 = arith.constant dense<0.000000e+00> : vector<2x128xf32>
    %178 = tpu.matmul %177, %0, %cst_65 {dimension_numbers = #tpu.dot_dimension_numbers<[1], [0], [0], [1], [0, 0, 1, 1], [], []>} : vector<2x128xf32>, vector<128x128xf32>, vector<2x128xf32> -> vector<2x128xf32>
    %cst_66 = arith.constant 9.99999991E-38 : f32
    %179 = vector.broadcast %cst_66 : f32 to vector<2x128xf32>
    %180 = arith.maximumf %178, %179 : vector<2x128xf32>
    %181 = math.log %180 : vector<2x128xf32>
    %182 = vector.broadcast %174 : vector<2x1xf32> to vector<2x128xf32>
    %183 = arith.addf %182, %181 : vector<2x128xf32>
    %184 = arith.addf %183, %172 : vector<2x128xf32>
    %185 = vector.broadcast %c7_i32 : i32 to vector<2x8xi32>
    %186 = arith.cmpi eq, %3, %185 : vector<2x8xi32>
    %cst_67 = arith.constant 0.000000e+00 : f32
    %187 = vector.broadcast %cst_67 : f32 to vector<2x8xf32>
    %188 = arith.select %186, %2, %187 : vector<2x8xi1>, vector<2x8xf32>
    %cst_68 = arith.constant dense<0.000000e+00> : vector<2xf32>
    %189 = vector.multi_reduction <add>, %188, %cst_68 [1] : vector<2x8xf32> to vector<2xf32>
    %190 = vector.shape_cast %189 : vector<2xf32> to vector<2x1xf32>
    %cst_69 = arith.constant 0.000000e+00 : f32
    %191 = vector.broadcast %cst_69 : f32 to vector<2x1xf32>
    %192 = arith.cmpf ogt, %190, %191 : vector<2x1xf32>
    %193 = vector.shape_cast %192 : vector<2x1xi1> to vector<2x1xi1>
    %194 = vector.broadcast %193 : vector<2x1xi1> to vector<2x128xi1>
    %195 = arith.select %194, %184, %168 : vector<2x128xi1>, vector<2x128xf32>
    %c7_i32_70 = arith.constant 7 : i32
    %cst_71 = arith.constant dense<0xFF800000> : vector<2xf32>
    %196 = vector.multi_reduction <maximumf>, %195, %cst_71 [1] : vector<2x128xf32> to vector<2xf32>
    %197 = vector.shape_cast %196 : vector<2xf32> to vector<2x1xf32>
    %198 = vector.broadcast %197 : vector<2x1xf32> to vector<2x128xf32>
    %199 = arith.subf %195, %198 : vector<2x128xf32>
    %200 = math.exp %199 : vector<2x128xf32>
    %cst_72 = arith.constant dense<0.000000e+00> : vector<2xf32>
    %201 = vector.multi_reduction <add>, %200, %cst_72 [1] : vector<2x128xf32> to vector<2xf32>
    %202 = vector.shape_cast %201 : vector<2xf32> to vector<2x1xf32>
    %203 = math.log %202 : vector<2x1xf32>
    %204 = arith.addf %197, %203 : vector<2x1xf32>
    %205 = vector.shape_cast %204 : vector<2x1xf32> to vector<2x1xf32>
    %206 = vector.broadcast %205 : vector<2x1xf32> to vector<2x128xf32>
    %c0_73 = arith.constant 0 : index
    %c0_74 = arith.constant 0 : index
    %c0_75 = arith.constant 0 : index
    %207 = vector.load %arg4[%c0_73, %c0_74, %c0_75] : memref<1x2x128xf32, #tpu.memory_space<vmem>>, vector<1x2x128xf32>
    %208 = vector.shape_cast %207 : vector<1x2x128xf32> to vector<2x128xf32>
    %209 = vector.shape_cast %206 : vector<2x128xf32> to vector<1x2x128xf32>
    tpu.vector_store %arg4[%c0_73, %c0_74, %c0_75], %209 {strides = array<i32>} : memref<1x2x128xf32, #tpu.memory_space<vmem>>, vector<1x2x128xf32>,
    return
  }
  func.func @transform_0(%arg0: i32) -> (i32, i32, i32, i32) {
    %c0_i32 = arith.constant 0 : i32
    %c0_i32_0 = arith.constant 0 : i32
    %c0_i32_1 = arith.constant 0 : i32
    %c0_i32_2 = arith.constant 0 : i32
    return %arg0, %c0_i32, %c0_i32_0, %c0_i32_1 : i32, i32, i32, i32
  }
  func.func @transform_1(%arg0: i32) -> (i32, i32, i32) {
    %c0_i32 = arith.constant 0 : i32
    %c0_i32_0 = arith.constant 0 : i32
    %c0_i32_1 = arith.constant 0 : i32
    return %arg0, %c0_i32, %c0_i32_0 : i32, i32, i32
  }
  func.func @transform_2(%arg0: i32) -> (i32, i32) {
    %c0_i32 = arith.constant 0 : i32
    %c0_i32_0 = arith.constant 0 : i32
    %c0_i32_1 = arith.constant 0 : i32
    return %c0_i32, %c0_i32_0 : i32, i32
  }
  func.func @transform_3(%arg0: i32) -> (i32, i32, i32) {
    %c0_i32 = arith.constant 0 : i32
    %c0_i32_0 = arith.constant 0 : i32
    %c0_i32_1 = arith.constant 0 : i32
    return %arg0, %c0_i32, %c0_i32_0 : i32, i32, i32
  }
}

</mosaic_0001>

<bundles_post_ra>
// kernel: content_planner_forward.2
= control target key start
LH: loop header
LB: loop body
LE: loop exit
PB: predicated region body
PF: predicated region fallthrough
CT: control target
= control target key end

     0   :  { %v301_v0 = vmov 0.0   ;;  %vm302_vm0 = vmmov 0   ;;  %v303_v10 = vmov 0   ;;  %v162_v26 = vlaneseq  ;;  %s400_s1 = inlined_call_operand.vmem [shape: bf16[128,128], index: 1, kind: input, shape index: {}]   ;;  %s401_s0 = inlined_call_operand.vmem [shape: bf16[16,128], index: 0, kind: input, shape index: {}]   ;;  %s402_s3 = inlined_call_operand.vmem [shape: s32[16,1], index: 3, kind: input, shape index: {}]   ;;  %s403_s2 = inlined_call_operand.vmem [shape: f32[1,128], index: 2, kind: input, shape index: {}]   ;;  %s404_s4 = inlined_call_operand.vmem [shape: f32[16,128], index: 4, kind: output, shape index: {0}]   ;;  %s405_s5 = inlined_call_operand.vmem [shape: f32[1,8,128], index: 5, kind: output, shape index: {1}]  }
   0x1   :  { %255 = vmatprep.subr.bf16.mxu0 %v301_v0  ;;  %v284_v1 = vld [vmem:[%s400_s1 + $0x38] sm:$0xff]   ;;  %271 = vmatprep.mubr.msk.bf16.mxu0 %vm302_vm0, %v301_v0  ;;  %v285_v2 = vld [vmem:[%s400_s1 + $0x30] sm:$0xff]   ;;  %v286_v3 = vld [vmem:[%s400_s1 + $0x28] sm:$0xff]   ;;  %vm188_vm5 = vcmask 7168  }
   0x2   :  { %256 = vmatpush3.bf16.msra.mxu0 %v284_v1  ;;  %v287_v4 = vld [vmem:[%s400_s1 + $0x20] sm:$0xff]   ;;  %v288_v5 = vld [vmem:[%s400_s1 + $0x18] sm:$0xff]   ;;  %v289_v6 = vld [vmem:[%s400_s1 + $0x10] sm:$0xff]   ;;  %282 = vset.pattern.permute.xlu1 %v303_v10  ;;  %v385_v28 = vand.u32 127, %v162_v26 }
   0x3   :  { %257 = vmatprep.subr.bf16.mxu0 %v301_v0  ;;  %v290_v7 = vld [vmem:[%s400_s1 + $0x8] sm:$0xff]   ;;  %v291_v8 = vld [vmem:[%s400_s1] sm:$0xff]   ;;  %283 = vset.pattern.permute.xlu0 %v303_v10 }
   0x4   :  { %v292_v9 = vld [vmem:[%s401_s0] sm:$0xff]   ;;  %v161_v12 = vld [vmem:[%s402_s3 + $0x8] sm:$0xff]  ;;  %vm219_vm7 = vcmp.eq.s32.totalorder %v385_v28, 1  ;;  %vm217_vm8 = vcmp.eq.s32.totalorder %v385_v28, 0 }
   0x5   :  { %v160_v11 = vld [vmem:[%s402_s3] sm:$0xff]  ;;  %vm179_vm4 = vcmp.ne.s32.totalorder %v161_v12, 0 }
   0x6   :  { %258 = vmatpush3.bf16.msra.mxu0 %v285_v2  ;;  %165 = vperm.xlu1 %282, %v160_v11   ;;  %v234_v13 = vld [vmem:[%s403_s2] ss:$0 sm:$0xff]  ;;  %vm178_vm3 = vcmp.ne.s32.totalorder %v160_v11, 0  ;;  %v245_v35 = vsel %vm179_vm4, 1.0, %v301_v0 }
   0x7   :  { %259 = vmatprep.subr.bf16.mxu0 %v301_v0  ;;  %v244_v34 = vsel %vm178_vm3, 1.0, %v301_v0  ;;  %v203_v37 = vsel %vm188_vm5, %v245_v35, 0.0 }
   0x8   :  { %v202_v36 = vsel %vm188_vm5, %v244_v34, 0.0 }
   0x9   :  { %v204_v38 = vadd.f32 %v203_v37, %v202_v36 }
   0xa   :  { %260 = vmatpush3.bf16.msra.mxu0 %v286_v3  ;;  %168 = vperm.xlu1 %282, %v161_v12  }
   0xb   :  { %261 = vmatprep.subr.bf16.mxu0 %v301_v0 }
   0xe   :  { %262 = vmatpush3.bf16.msra.mxu0 %v287_v4  ;;  %v215_v4 = vshrl.u32 %v162_v26, 7 }
   0xf   :  { %263 = vmatprep.subr.bf16.mxu0 %v301_v0 }
  0x10   :  { %vm216_vm6 = vcmp.eq.s32.totalorder %v215_v4, 0 }
  0x11   :  { %vm220_vm9 = vmand %vm216_vm6, %vm219_vm7 }
  0x12   :  { %264 = vmatpush3.bf16.msra.mxu0 %v288_v5  ;;  %vm218_vm10 = vmand %vm216_vm6, %vm217_vm8 }
  0x13   :  { %265 = vmatprep.subr.bf16.mxu0 %v301_v0 }
  0x16   :  { %266 = vmatpush3.bf16.msra.mxu0 %v289_v6 }
  0x17   :  { %267 = vmatprep.subr.bf16.mxu0 %v301_v0 }
  0x1a   :  { %268 = vmatpush3.bf16.msra.mxu0 %v290_v7 }
  0x1b   :  { %269 = vmatprep.subr.bf16.mxu0 %v301_v0 }
  0x1e   :  { %270 = vmatpush3.bf16.msra.mxu0 %v291_v8 }
  0x21   :  { %272 = vmatmul.mubr.bf16.vlgmr.msra.gmra.mxu0 %v292_v9 }
  0x81   :  { %v166_v27 = vpop.permute.xlu1 %165 }
  0x82   :  { %vm170_vm1 = vcmp.eq.s32.totalorder %v385_v28, %v166_v27 }
  0x85   :  { %v169_v30 = vpop.permute.xlu1 %168 }
  0x86   :  { %vm171_vm2 = vcmp.eq.s32.totalorder %v385_v28, %v169_v30 }
  0xe1   :  { %v133_v14 = vpop.f32.mrf.mxu0 }
  0xe2   :  { %v134_v15 = vadd.f32 %v234_v13, %v133_v14 }
  0xe3   :  { %v273_v16 = vpop.f32.mrf.mxu0 }
  0xe4   :  { %140 = vst [vmem:[%s404_s4] sm:$0xff] %v134_v15  ;;  %142 = vmax.xlane.f32.xlu0 %v134_v15 }
  0xe5   :  { %v136_v17 = vpop.f32.mrf.mxu0 }
  0xe6   :  { %v137_v18 = vadd.f32 %v234_v13, %v136_v17 }
  0xe7   :  { %v274_v19 = vpop.f32.mrf.mxu0 }
  0xe8   :  { %141 = vst [vmem:[%s404_s4 + $0x8] sm:$0xff] %v137_v18  ;;  %144 = vmax.xlane.f32.xlu0 %v137_v18 }
 0x16d   :  { %v143_v20 = vpop.xlane.xlu0 %142 }
 0x16e   :  { %v146_v21 = vsub.f32 %v134_v15, %v143_v20 }
 0x170   :  { %v148_v22 = vmul.f32 1.442695, %v146_v21  ;;  %v172_v32 = vsel %vm170_vm1, %v146_v21, 0.0 }
 0x171   :  { %v145_v23 = vpop.xlane.xlu0 %144 }
 0x172   :  { %293 = vpow2.f32 %v148_v22  ;;  %v147_v24 = vsub.f32 %v137_v18, %v145_v23 }
 0x174   :  { %v150_v25 = vmul.f32 1.442695, %v147_v24  ;;  %v173_v33 = vsel %vm171_vm2, %v147_v24, 0.0 }
 0x176   :  { %295 = vpow2.f32 %v150_v25 }
 0x17f   :  { %v294_v29 = vpop.eup %293 }
 0x180   :  { %152 = vadd.xlane.f32.xlu0 %v294_v29 }
 0x183   :  { %v296_v31 = vpop.eup %295 }
 0x184   :  { %174 = vadd.xlane.f32.xlu0 %v172_v32  ;;  %154 = vadd.xlane.f32.xlu1 %v296_v31 }
 0x188   :  { %176 = vadd.xlane.f32.xlu0 %v173_v33 }
 0x209   :  { %v153_v39 = vpop.xlane.xlu0 %152 }
 0x20a   :  { %297 = vlog2.f32 %v153_v39 }
 0x20d   :  { %v155_v40 = vpop.xlane.xlu1 %154  ;;  %v175_v42 = vpop.xlane.xlu0 %174 }
 0x20e   :  { %299 = vlog2.f32 %v155_v40 }
 0x211   :  { %v177_v47 = vpop.xlane.xlu0 %176 }
 0x217   :  { %v298_v41 = vpop.eup %297 }
 0x218   :  { %v157_v43 = vmul.f32 0.6931472, %v298_v41 }
 0x21a   :  { %v184_v44 = vsub.f32 %v175_v42, %v157_v43 }
 0x21b   :  { %v300_v45 = vpop.eup %299 }
 0x21c   :  { %v159_v46 = vmul.f32 0.6931472, %v300_v45  ;;  %v186_v48 = vmul.f32 %v244_v34, %v184_v44 }
 0x21e   :  { %v185_v49 = vsub.f32 %v177_v47, %v159_v46  ;;  %v189_v51 = vsel %vm188_vm5, %v186_v48, 0.0 }
 0x220   :  { %v187_v50 = vmul.f32 %v245_v35, %v185_v49 }
 0x222   :  { %v190_v52 = vsel %vm188_vm5, %v187_v50, 0.0 }
 0x223   :  { %v191_v53 = vadd.f32 %v190_v52, %v189_v51 }
 0x225   :  { %192 = vadd.xlane.f32.xlu0 %v191_v53 }
 0x229   :  { %205 = vadd.xlane.f32.xlu0 %v204_v38 }
 0x2ae   :  { %v193_v54 = vpop.xlane.xlu0 %192 }
 0x2af   :  { %v194_v55 = vrot.slane %v193_v54, 4 }
 0x2b1   :  { %v195_v56 = vadd.f32 %v194_v55, %v193_v54 }
 0x2b2   :  { %v206_v57 = vpop.xlane.xlu0 %205 }
 0x2b3   :  { %v196_v58 = vrot.slane %v195_v56, 2  ;;  %v207_v59 = vrot.slane %v206_v57, 4 }
 0x2b5   :  { %v208_v60 = vadd.f32 %v207_v59, %v206_v57  ;;  %v197_v61 = vadd.f32 %v196_v58, %v195_v56 }
 0x2b7   :  { %v209_v62 = vrot.slane %v208_v60, 2  ;;  %v198_v63 = vrot.slane %v197_v61, 1 }
 0x2b9   :  { %v210_v0 = vadd.f32 %v209_v62, %v208_v60  ;;  %v199_v1 = vadd.f32 %v198_v63, %v197_v61 }
 0x2bb   :  { %275 = vpush %v199_v1  ;;  %v211_v2 = vrot.slane %v210_v0, 1 }
 0x2bd   :  { %v212_v3 = vadd.f32 %v211_v2, %v210_v0 }
 0x2bf   :  { %277 = vpush %v212_v3 }
 0x2ec   :  { %s276_s2 = spop %275 }
 0x2ed   :  { %s201_s3 = ssub.f32 0.0, %s276_s2 }
 0x2ef   :  { %v223_v6 = vstv %s201_s3 }
 0x2f0   :  { %s278_s4 = spop %277 }
 0x2f1   :  { %v221_v5 = vstv %s278_s4 }
 0x2f2   :  { %v222_v7 = vsel %vm220_vm9, %v221_v5, 0.0 }
 0x2f3   :  { %v224_v8 = vsel %vm218_vm10, %v223_v6, %v222_v7 }
 0x2f4   :  { %225 = vst [vmem:[%s405_s5] sm:$0xff] %v224_v8 }

// kernel: content_planner_forward.3
= control target key start
LH: loop header
LB: loop body
LE: loop exit
PB: predicated region body
PF: predicated region fallthrough
CT: control target
= control target key end

     0   :  { %vm40_vm0 = vcmask 1041409   ;;  %v1151_v2 = vmov 0.0   ;;  %vm43_vm1 = vcmask 1041408   ;;  %vm1152_vm2 = vmmov 0   ;;  %s1600_s0 = inlined_call_operand.vmem [shape: f32[1,2,8,128], index: 0, kind: input, shape index: {}]   ;;  %s1601_s2 = inlined_call_operand.vmem [shape: f32[128,128], index: 2, kind: input, shape index: {}]   ;;  %s1602_s1 = inlined_call_operand.vmem [shape: f32[1,2,8], index: 1, kind: input, shape index: {}]   ;;  %s1603_s3 = inlined_call_operand.vmem [shape: f32[1,2,128], index: 3, kind: output, shape index: {}]  }
   0x1   :  { %v1176_v0 = vld [vmem:[%s1600_s0] sm:$0x1]  ;;  %v1181_v1 = vld [vmem:[%s1600_s0 + $0x8] sm:$0x1]  ;;  %870 = vmatprep.subr.mxu0 %v1151_v2  ;;  %v1187_v3 = vld [vmem:[%s1601_s2 + $0x78] sm:$0xff]  ;;  %905 = vmatprep.subr.mxu1 %v1151_v2  ;;  %v31_v22 = vlaneseq  ;;  %vm144_vm3 = vcmask 58368  }
   0x2   :  { %v39_v4 = vrot.slane %v1181_v1, 7  ;;  %871 = vmatpush3.msra.mxu0 %v1187_v3  ;;  %v1195_v5 = vld [vmem:[%s1601_s2 + $0x70] sm:$0xff]  ;;  %906 = vmatpush3.msra.mxu1 %v1187_v3  ;;  %v1202_v6 = vld [vmem:[%s1601_s2 + $0x68] sm:$0xff]  ;;  %v1217_v9 = vld [vmem:[%s1601_s2 + $0x60] sm:$0xff] }
   0x3   :  { %872 = vmatprep.subr.mxu0 %v1151_v2  ;;  %907 = vmatprep.subr.mxu1 %v1151_v2  ;;  %v1231_v10 = vld [vmem:[%s1601_s2 + $0x58] sm:$0xff]  ;;  %v1239_v11 = vld [vmem:[%s1601_s2 + $0x50] sm:$0xff]  ;;  %v1248_v12 = vld [vmem:[%s1601_s2 + $0x48] sm:$0xff]  ;;  %v1345_v24 = vand.u32 127, %v31_v22 }
   0x4   :  { %v1207_v7 = vsel %vm40_vm0, %v39_v4, %v1176_v0  ;;  %873 = vmatpush3.msra.mxu0 %v1195_v5  ;;  %908 = vmatpush3.msra.mxu1 %v1195_v5  ;;  %v1257_v13 = vld [vmem:[%s1601_s2 + $0x40] sm:$0xff]  ;;  %v1264_v14 = vld [vmem:[%s1601_s2 + $0x38] sm:$0xff]  ;;  %v1271_v15 = vld [vmem:[%s1601_s2 + $0x30] sm:$0xff] }
   0x5   :  { %v44_v8 = vsel %vm43_vm1, %v1207_v7, -inf  ;;  %874 = vmatprep.subr.mxu0 %v1151_v2  ;;  %909 = vmatprep.subr.mxu1 %v1151_v2  ;;  %v1281_v16 = vld [vmem:[%s1601_s2 + $0x28] sm:$0xff]  ;;  %v1290_v17 = vld [vmem:[%s1601_s2 + $0x20] sm:$0xff]  ;;  %v1299_v18 = vld [vmem:[%s1601_s2 + $0x18] sm:$0xff]  ;;  %vm142_vm4 = vcmp.eq.s32.totalorder %v1345_v24, 1  ;;  %vm240_vm6 = vcmp.eq.s32.totalorder %v1345_v24, 2 }
   0x6   :  { %45 = vmax.xlane.f32.xlu0 %v44_v8  ;;  %875 = vmatpush3.msra.mxu0 %v1202_v6  ;;  %v1308_v19 = vld [vmem:[%s1601_s2 + $0x10] sm:$0xff]  ;;  %v1317_v20 = vld [vmem:[%s1601_s2 + $0x8] sm:$0xff]  ;;  %v1326_v21 = vld [vmem:[%s1601_s2] sm:$0xff]  ;;  %vm337_vm8 = vcmp.eq.s32.totalorder %v1345_v24, 3  ;;  %vm434_vm10 = vcmp.eq.s32.totalorder %v1345_v24, 4  ;;  %vm531_vm12 = vcmp.eq.s32.totalorder %v1345_v24, 5 }
   0x7   :  { %876 = vmatprep.subr.mxu0 %v1151_v2  ;;  %910 = vmatpush3.msra.mxu1 %v1202_v6  ;;  %v1343_v23 = vld [vmem:[%s1602_s1] sm:$0x3]  ;;  %v36_v40 = vld [vmem:[%s1600_s0 + $0x9] sm:$0x1]  ;;  %v153_v60 = vld [vmem:[%s1600_s0 + $0xa] sm:$0x1] }
   0x8   :  { %877 = vmatpush3.msra.mxu0 %v1217_v9  ;;  %911 = vmatprep.subr.mxu1 %v1151_v2  ;;  %v143_v25 = vsel %vm142_vm4, %v1343_v23, 0.0  ;;  %v138_v41 = vrot.slane %v36_v40, 7  ;;  %v35_v42 = vld [vmem:[%s1600_s0 + $0x1] sm:$0x1]  ;;  %v241_v51 = vsel %vm240_vm6, %v1343_v23, 0.0  ;;  %v236_v61 = vrot.slane %v153_v60, 7 }
   0x9   :  { %878 = vmatprep.subr.mxu0 %v1151_v2  ;;  %912 = vmatpush3.msra.mxu1 %v1217_v9  ;;  %v145_v26 = vsel %vm144_vm3, %v143_v25, 0.0  ;;  %v242_v52 = vsel %vm144_vm3, %v241_v51, 0.0  ;;  %v152_v62 = vld [vmem:[%s1600_s0 + $0x2] sm:$0x1]  ;;  %vm628_vm14 = vcmp.eq.s32.totalorder %v1345_v24, 6 }
   0xa   :  { %913 = vmatprep.subr.mxu1 %v1151_v2  ;;  %879 = vmatpush3.msra.mxu0 %v1231_v10  ;;  %v139_v46 = vsel %vm40_vm0, %v138_v41, %v35_v42  ;;  %v237_v4 = vsel %vm40_vm0, %v236_v61, %v152_v62 }
   0xb   :  { %914 = vmatpush3.msra.mxu1 %v1231_v10  ;;  %880 = vmatprep.subr.mxu0 %v1151_v2 }
   0xc   :  { %915 = vmatprep.subr.mxu1 %v1151_v2  ;;  %881 = vmatpush3.msra.mxu0 %v1239_v11 }
   0xd   :  { %916 = vmatpush3.msra.mxu1 %v1239_v11  ;;  %882 = vmatprep.subr.mxu0 %v1151_v2 }
   0xe   :  { %917 = vmatprep.subr.mxu1 %v1151_v2  ;;  %883 = vmatpush3.msra.mxu0 %v1248_v12 }
   0xf   :  { %918 = vmatpush3.msra.mxu1 %v1248_v12  ;;  %884 = vmatprep.subr.mxu0 %v1151_v2 }
  0x10   :  { %919 = vmatprep.subr.mxu1 %v1151_v2  ;;  %885 = vmatpush3.msra.mxu0 %v1257_v13 }
  0x11   :  { %920 = vmatpush3.msra.mxu1 %v1257_v13  ;;  %886 = vmatprep.subr.mxu0 %v1151_v2 }
  0x12   :  { %902 = vmatprep.mubr.msk.f32.mxu0 %vm1152_vm2, %v1151_v2  ;;  %887 = vmatpush3.msra.mxu0 %v1264_v14 }
  0x13   :  { %921 = vmatprep.subr.mxu1 %v1151_v2  ;;  %888 = vmatprep.subr.mxu0 %v1151_v2 }
  0x14   :  { %922 = vmatpush3.msra.mxu1 %v1264_v14  ;;  %889 = vmatpush3.msra.mxu0 %v1271_v15 }
  0x15   :  { %923 = vmatprep.subr.mxu1 %v1151_v2  ;;  %890 = vmatprep.subr.mxu0 %v1151_v2 }
  0x16   :  { %924 = vmatpush3.msra.mxu1 %v1271_v15  ;;  %891 = vmatpush3.msra.mxu0 %v1281_v16 }
  0x17   :  { %925 = vmatprep.subr.mxu1 %v1151_v2  ;;  %892 = vmatprep.subr.mxu0 %v1151_v2 }
  0x18   :  { %926 = vmatpush3.msra.mxu1 %v1281_v16  ;;  %893 = vmatpush3.msra.mxu0 %v1290_v17 }
  0x19   :  { %927 = vmatprep.subr.mxu1 %v1151_v2  ;;  %894 = vmatprep.subr.mxu0 %v1151_v2 }
  0x1a   :  { %928 = vmatpush3.msra.mxu1 %v1290_v17  ;;  %895 = vmatpush3.msra.mxu0 %v1299_v18 }
  0x1b   :  { %929 = vmatprep.subr.mxu1 %v1151_v2  ;;  %896 = vmatprep.subr.mxu0 %v1151_v2 }
  0x1c   :  { %930 = vmatpush3.msra.mxu1 %v1299_v18  ;;  %897 = vmatpush3.msra.mxu0 %v1308_v19 }
  0x1d   :  { %931 = vmatprep.subr.mxu1 %v1151_v2  ;;  %898 = vmatprep.subr.mxu0 %v1151_v2 }
  0x1e   :  { %932 = vmatpush3.msra.mxu1 %v1308_v19  ;;  %899 = vmatpush3.msra.mxu0 %v1317_v20 }
  0x1f   :  { %933 = vmatprep.subr.mxu1 %v1151_v2  ;;  %900 = vmatprep.subr.mxu0 %v1151_v2 }
  0x20   :  { %934 = vmatpush3.msra.mxu1 %v1317_v20  ;;  %901 = vmatpush3.msra.mxu0 %v1326_v21 }
  0x21   :  { %935 = vmatprep.subr.mxu1 %v1151_v2  ;;  %937 = vmatprep.mubr.msk.f32.mxu1 %vm1152_vm2, %v1151_v2 }
  0x22   :  { %936 = vmatpush3.msra.mxu1 %v1326_v21  ;;  %940 = vmatprep.subr.mxu0 %v1151_v2 }
  0x23   :  { %975 = vmatprep.subr.mxu1 %v1151_v2  ;;  %146 = vadd.xlane.f32.xlu0 %v145_v26  ;;  %v338_v26 = vsel %vm337_vm8, %v1343_v23, 0.0 }
  0x8f   :  { %v46_v27 = vpop.xlane.xlu0 %45 }
  0x90   :  { %v48_v28 = vrot.slane %v46_v27, 1  ;;  %v51_v29 = vsub.f32 %v1176_v0, %v46_v27 }
  0x92   :  { %v52_v30 = vsub.f32 %v1181_v1, %v48_v28  ;;  %v53_v31 = vmul.f32 1.442695, %v51_v29 }
  0x94   :  { %v55_v32 = vmul.f32 1.442695, %v52_v30 }
  0x96   :  { %1117 = vpow2.f32 %v55_v32 }
  0x97   :  { %1119 = vpow2.f32 %v53_v31 }
  0xa3   :  { %v1118_v33 = vpop.eup %1117 }
  0xa4   :  { %v59_v34 = vrot.slane %v1118_v33, 7  ;;  %v1120_v35 = vpop.eup %1119 }
  0xa6   :  { %v60_v36 = vsel %vm40_vm0, %v59_v34, %v1120_v35  ;;  %v250_v35 = vld [vmem:[%s1600_s0 + $0xb] sm:$0x1] }
  0xa7   :  { %903 = vmatmul.mubr.f32.vlgmr.msra.gmra.mxu0 %v60_v36  ;;  %v333_v36 = vrot.slane %v250_v35, 7  ;;  %v540_v35 = vld [vmem:[%s1600_s0 + $0x6] sm:$0x1] }
  0xa8   :  { %941 = vmatpush3.msra.mxu0 %v1187_v3  ;;  %972 = vmatprep.mubr.msk.f32.mxu0 %vm1152_vm2, %v1151_v2 }
  0xa9   :  { %942 = vmatprep.subr.mxu0 %v1151_v2 }
  0xaa   :  { %943 = vmatpush3.msra.mxu0 %v1195_v5 }
  0xab   :  { %944 = vmatprep.subr.mxu0 %v1151_v2 }
  0xac   :  { %945 = vmatpush3.msra.mxu0 %v1202_v6  ;;  %v147_v45 = vpop.xlane.xlu0 %146 }
  0xad   :  { %946 = vmatprep.subr.mxu0 %v1151_v2  ;;  %vm148_vm5 = vcmp.gt.f32.partialorder %v147_v45, 0.0 }
  0xae   :  { %947 = vmatpush3.msra.mxu0 %v1217_v9 }
  0xaf   :  { %948 = vmatprep.subr.mxu0 %v1151_v2 }
  0xb0   :  { %949 = vmatpush3.msra.mxu0 %v1231_v10 }
  0xb1   :  { %950 = vmatprep.subr.mxu0 %v1151_v2 }
  0xb2   :  { %951 = vmatpush3.msra.mxu0 %v1239_v11 }
  0xb3   :  { %952 = vmatprep.subr.mxu0 %v1151_v2 }
  0xb4   :  { %953 = vmatpush3.msra.mxu0 %v1248_v12 }
  0xb5   :  { %954 = vmatprep.subr.mxu0 %v1151_v2 }
  0xb6   :  { %955 = vmatpush3.msra.mxu0 %v1257_v13 }
  0xb7   :  { %956 = vmatprep.subr.mxu0 %v1151_v2 }
  0xb8   :  { %957 = vmatpush3.msra.mxu0 %v1264_v14 }
  0xb9   :  { %958 = vmatprep.subr.mxu0 %v1151_v2 }
  0xba   :  { %959 = vmatpush3.msra.mxu0 %v1271_v15 }
  0xbb   :  { %960 = vmatprep.subr.mxu0 %v1151_v2 }
  0xbc   :  { %961 = vmatpush3.msra.mxu0 %v1281_v16 }
  0xbd   :  { %962 = vmatprep.subr.mxu0 %v1151_v2 }
  0xbe   :  { %963 = vmatpush3.msra.mxu0 %v1290_v17 }
  0xbf   :  { %964 = vmatprep.subr.mxu0 %v1151_v2 }
  0xc0   :  { %965 = vmatpush3.msra.mxu0 %v1299_v18 }
  0xc1   :  { %966 = vmatprep.subr.mxu0 %v1151_v2 }
  0xc2   :  { %967 = vmatpush3.msra.mxu0 %v1308_v19 }
  0xc3   :  { %968 = vmatprep.subr.mxu0 %v1151_v2 }
  0xc4   :  { %969 = vmatpush3.msra.mxu0 %v1317_v20 }
  0xc5   :  { %970 = vmatprep.subr.mxu0 %v1151_v2 }
  0xc6   :  { %971 = vmatpush3.msra.mxu0 %v1326_v21 }
  0xc7   :  { %1010 = vmatprep.subr.mxu0 %v1151_v2 }
 0x167   :  { %v128_v37 = vpop.f32.mrf.mxu0 }
 0x168   :  { %v132_v38 = vmax.f32 %v128_v37, 1e-37  ;;  %v249_v37 = vld [vmem:[%s1600_s0 + $0x3] sm:$0x1] }
 0x169   :  { %v904_v39 = vpop.f32.mrf.mxu0  ;;  %v334_v41 = vsel %vm40_vm0, %v333_v36, %v249_v37 }
 0x16a   :  { %1121 = vlog2.f32 %v132_v38 }
 0x177   :  { %v1122_v43 = vpop.eup %1121 }
 0x178   :  { %v134_v44 = vmul.f32 0.6931472, %v1122_v43 }
 0x17a   :  { %v135_v47 = vadd.f32 %v134_v44, %v46_v27  ;;  %v339_v27 = vsel %vm144_vm3, %v338_v26, 0.0 }
 0x17c   :  { %v141_v48 = vadd.f32 %v139_v46, %v135_v47  ;;  %v435_v46 = vsel %vm434_vm10, %v1343_v23, 0.0 }
 0x17d   :  { %v436_v47 = vsel %vm144_vm3, %v435_v46, 0.0 }
 0x17e   :  { %v151_v49 = vsel %vm148_vm5, %v141_v48, %v1207_v7 }
 0x17f   :  { %v154_v50 = vsel %vm43_vm1, %v151_v49, -inf }
 0x180   :  { %155 = vmax.xlane.f32.xlu1 %v154_v50 }
 0x184   :  { %243 = vadd.xlane.f32.xlu1 %v242_v52 }
 0x188   :  { %340 = vadd.xlane.f32.xlu1 %v339_v27 }
 0x18c   :  { %437 = vadd.xlane.f32.xlu1 %v436_v47 }
 0x209   :  { %v156_v53 = vpop.xlane.xlu1 %155 }
 0x20a   :  { %v157_v54 = vsub.f32 %v151_v49, %v156_v53 }
 0x20c   :  { %v158_v55 = vmul.f32 1.442695, %v157_v54 }
 0x20d   :  { %v244_v1 = vpop.xlane.xlu1 %243 }
 0x20e   :  { %1123 = vpow2.f32 %v158_v55  ;;  %vm245_vm7 = vcmp.gt.f32.partialorder %v244_v1, 0.0  ;;  %v347_v55 = vld [vmem:[%s1600_s0 + $0xc] sm:$0x1] }
 0x211   :  { %v341_v40 = vpop.xlane.xlu1 %340 }
 0x212   :  { %vm342_vm9 = vcmp.gt.f32.partialorder %v341_v40, 0.0 }
 0x215   :  { %v438_v60 = vpop.xlane.xlu1 %437 }
 0x216   :  { %vm439_vm11 = vcmp.gt.f32.partialorder %v438_v60, 0.0 }
 0x21b   :  { %v1124_v56 = vpop.eup %1123 }
 0x21c   :  { %938 = vmatmul.mubr.f32.vlgmr.msra.gmra.mxu1 %v1124_v56  ;;  %v430_v56 = vrot.slane %v347_v55, 7 }
 0x21d   :  { %976 = vmatpush3.msra.mxu1 %v1187_v3  ;;  %1007 = vmatprep.mubr.msk.f32.mxu1 %vm1152_vm2, %v1151_v2 }
 0x21e   :  { %977 = vmatprep.subr.mxu1 %v1151_v2 }
 0x21f   :  { %978 = vmatpush3.msra.mxu1 %v1195_v5 }
 0x220   :  { %979 = vmatprep.subr.mxu1 %v1151_v2 }
 0x221   :  { %980 = vmatpush3.msra.mxu1 %v1202_v6 }
 0x222   :  { %981 = vmatprep.subr.mxu1 %v1151_v2 }
 0x223   :  { %982 = vmatpush3.msra.mxu1 %v1217_v9 }
 0x224   :  { %983 = vmatprep.subr.mxu1 %v1151_v2 }
 0x225   :  { %984 = vmatpush3.msra.mxu1 %v1231_v10 }
 0x226   :  { %985 = vmatprep.subr.mxu1 %v1151_v2 }
 0x227   :  { %986 = vmatpush3.msra.mxu1 %v1239_v11 }
 0x228   :  { %987 = vmatprep.subr.mxu1 %v1151_v2 }
 0x229   :  { %988 = vmatpush3.msra.mxu1 %v1248_v12 }
 0x22a   :  { %989 = vmatprep.subr.mxu1 %v1151_v2 }
 0x22b   :  { %990 = vmatpush3.msra.mxu1 %v1257_v13 }
 0x22c   :  { %991 = vmatprep.subr.mxu1 %v1151_v2 }
 0x22d   :  { %992 = vmatpush3.msra.mxu1 %v1264_v14 }
 0x22e   :  { %993 = vmatprep.subr.mxu1 %v1151_v2 }
 0x22f   :  { %994 = vmatpush3.msra.mxu1 %v1271_v15 }
 0x230   :  { %995 = vmatprep.subr.mxu1 %v1151_v2 }
 0x231   :  { %996 = vmatpush3.msra.mxu1 %v1281_v16 }
 0x232   :  { %997 = vmatprep.subr.mxu1 %v1151_v2 }
 0x233   :  { %998 = vmatpush3.msra.mxu1 %v1290_v17 }
 0x234   :  { %999 = vmatprep.subr.mxu1 %v1151_v2 }
 0x235   :  { %1000 = vmatpush3.msra.mxu1 %v1299_v18 }
 0x236   :  { %1001 = vmatprep.subr.mxu1 %v1151_v2 }
 0x237   :  { %1002 = vmatpush3.msra.mxu1 %v1308_v19 }
 0x238   :  { %1003 = vmatprep.subr.mxu1 %v1151_v2 }
 0x239   :  { %1004 = vmatpush3.msra.mxu1 %v1317_v20 }
 0x23a   :  { %1005 = vmatprep.subr.mxu1 %v1151_v2 }
 0x23b   :  { %1006 = vmatpush3.msra.mxu1 %v1326_v21 }
 0x23c   :  { %1045 = vmatprep.subr.mxu1 %v1151_v2 }
 0x2dc   :  { %v226_v57 = vpop.f32.mrf.mxu1 }
 0x2dd   :  { %v230_v58 = vmax.f32 %v226_v57, 1e-37  ;;  %v346_v57 = vld [vmem:[%s1600_s0 + $0x4] sm:$0x1] }
 0x2de   :  { %v939_v59 = vpop.f32.mrf.mxu1  ;;  %v431_v61 = vsel %vm40_vm0, %v430_v56, %v346_v57 }
 0x2df   :  { %1125 = vlog2.f32 %v230_v58 }
 0x2ec   :  { %v1126_v63 = vpop.eup %1125 }
 0x2ed   :  { %v232_v0 = vmul.f32 0.6931472, %v1126_v63 }
 0x2ef   :  { %v233_v7 = vadd.f32 %v232_v0, %v156_v53 }
 0x2f1   :  { %v239_v8 = vadd.f32 %v237_v4, %v233_v7  ;;  %v532_v4 = vsel %vm531_vm12, %v1343_v23, 0.0 }
 0x2f2   :  { %v533_v7 = vsel %vm144_vm3, %v532_v4, 0.0 }
 0x2f3   :  { %v248_v22 = vsel %vm245_vm7, %v239_v8, %v151_v49  ;;  %534 = vadd.xlane.f32.xlu1 %v533_v7 }
 0x2f4   :  { %v251_v25 = vsel %vm43_vm1, %v248_v22, -inf }
 0x2f5   :  { %252 = vmax.xlane.f32.xlu0 %v251_v25 }
 0x37e   :  { %v253_v28 = vpop.xlane.xlu0 %252 }
 0x37f   :  { %v254_v29 = vsub.f32 %v248_v22, %v253_v28 }
 0x381   :  { %v255_v30 = vmul.f32 1.442695, %v254_v29 }
 0x383   :  { %1127 = vpow2.f32 %v255_v30 }
 0x390   :  { %v1128_v31 = vpop.eup %1127 }
 0x391   :  { %973 = vmatmul.mubr.f32.vlgmr.msra.gmra.mxu0 %v1128_v31 }
 0x392   :  { %1011 = vmatpush3.msra.mxu0 %v1187_v3  ;;  %1042 = vmatprep.mubr.msk.f32.mxu0 %vm1152_vm2, %v1151_v2 }
 0x393   :  { %1012 = vmatprep.subr.mxu0 %v1151_v2 }
 0x394   :  { %1013 = vmatpush3.msra.mxu0 %v1195_v5 }
 0x395   :  { %1014 = vmatprep.subr.mxu0 %v1151_v2 }
 0x396   :  { %1015 = vmatpush3.msra.mxu0 %v1202_v6 }
 0x397   :  { %1016 = vmatprep.subr.mxu0 %v1151_v2 }
 0x398   :  { %1017 = vmatpush3.msra.mxu0 %v1217_v9 }
 0x399   :  { %1018 = vmatprep.subr.mxu0 %v1151_v2 }
 0x39a   :  { %1019 = vmatpush3.msra.mxu0 %v1231_v10 }
 0x39b   :  { %1020 = vmatprep.subr.mxu0 %v1151_v2 }
 0x39c   :  { %1021 = vmatpush3.msra.mxu0 %v1239_v11 }
 0x39d   :  { %1022 = vmatprep.subr.mxu0 %v1151_v2 }
 0x39e   :  { %1023 = vmatpush3.msra.mxu0 %v1248_v12 }
 0x39f   :  { %1024 = vmatprep.subr.mxu0 %v1151_v2 }
 0x3a0   :  { %1025 = vmatpush3.msra.mxu0 %v1257_v13 }
 0x3a1   :  { %1026 = vmatprep.subr.mxu0 %v1151_v2 }
 0x3a2   :  { %1027 = vmatpush3.msra.mxu0 %v1264_v14 }
 0x3a3   :  { %1028 = vmatprep.subr.mxu0 %v1151_v2 }
 0x3a4   :  { %1029 = vmatpush3.msra.mxu0 %v1271_v15 }
 0x3a5   :  { %1030 = vmatprep.subr.mxu0 %v1151_v2 }
 0x3a6   :  { %1031 = vmatpush3.msra.mxu0 %v1281_v16 }
 0x3a7   :  { %1032 = vmatprep.subr.mxu0 %v1151_v2 }
 0x3a8   :  { %1033 = vmatpush3.msra.mxu0 %v1290_v17 }
 0x3a9   :  { %1034 = vmatprep.subr.mxu0 %v1151_v2 }
 0x3aa   :  { %1035 = vmatpush3.msra.mxu0 %v1299_v18 }
 0x3ab   :  { %1036 = vmatprep.subr.mxu0 %v1151_v2 }
 0x3ac   :  { %1037 = vmatpush3.msra.mxu0 %v1308_v19 }
 0x3ad   :  { %1038 = vmatprep.subr.mxu0 %v1151_v2 }
 0x3ae   :  { %1039 = vmatpush3.msra.mxu0 %v1317_v20 }
 0x3af   :  { %1040 = vmatprep.subr.mxu0 %v1151_v2 }
 0x3b0   :  { %1041 = vmatpush3.msra.mxu0 %v1326_v21 }
 0x3b1   :  { %1080 = vmatprep.subr.mxu0 %v1151_v2 }
 0x451   :  { %v323_v32 = vpop.f32.mrf.mxu0 }
 0x452   :  { %v327_v33 = vmax.f32 %v323_v32, 1e-37 }
 0x453   :  { %v974_v34 = vpop.f32.mrf.mxu0 }
 0x454   :  { %1129 = vlog2.f32 %v327_v33  ;;  %v541_v33 = vld [vmem:[%s1600_s0 + $0xe] sm:$0x1] }
 0x455   :  { %v624_v34 = vrot.slane %v541_v33, 7 }
 0x461   :  { %v1130_v38 = vpop.eup %1129 }
 0x462   :  { %v329_v39 = vmul.f32 0.6931472, %v1130_v38 }
 0x464   :  { %v330_v42 = vadd.f32 %v329_v39, %v253_v28  ;;  %v625_v39 = vsel %vm40_vm0, %v624_v34, %v540_v35 }
 0x466   :  { %v336_v43 = vadd.f32 %v334_v41, %v330_v42 }
 0x468   :  { %v345_v44 = vsel %vm342_vm9, %v336_v43, %v248_v22 }
 0x469   :  { %v348_v45 = vsel %vm43_vm1, %v345_v44, -inf }
 0x46a   :  { %349 = vmax.xlane.f32.xlu0 %v348_v45 }
 0x4f3   :  { %v350_v48 = vpop.xlane.xlu0 %349 }
 0x4f4   :  { %v351_v49 = vsub.f32 %v345_v44, %v350_v48 }
 0x4f6   :  { %v352_v50 = vmul.f32 1.442695, %v351_v49 }
 0x4f8   :  { %1131 = vpow2.f32 %v352_v50 }
 0x505   :  { %v1132_v51 = vpop.eup %1131 }
 0x506   :  { %1008 = vmatmul.mubr.f32.vlgmr.msra.gmra.mxu1 %v1132_v51 }
 0x507   :  { %1046 = vmatpush3.msra.mxu1 %v1187_v3  ;;  %1077 = vmatprep.mubr.msk.f32.mxu1 %vm1152_vm2, %v1151_v2 }
 0x508   :  { %1047 = vmatprep.subr.mxu1 %v1151_v2 }
 0x509   :  { %1048 = vmatpush3.msra.mxu1 %v1195_v5 }
 0x50a   :  { %1049 = vmatprep.subr.mxu1 %v1151_v2 }
 0x50b   :  { %1050 = vmatpush3.msra.mxu1 %v1202_v6 }
 0x50c   :  { %1051 = vmatprep.subr.mxu1 %v1151_v2 }
 0x50d   :  { %1052 = vmatpush3.msra.mxu1 %v1217_v9 }
 0x50e   :  { %1053 = vmatprep.subr.mxu1 %v1151_v2 }
 0x50f   :  { %1054 = vmatpush3.msra.mxu1 %v1231_v10 }
 0x510   :  { %1055 = vmatprep.subr.mxu1 %v1151_v2 }
 0x511   :  { %1056 = vmatpush3.msra.mxu1 %v1239_v11 }
 0x512   :  { %1057 = vmatprep.subr.mxu1 %v1151_v2 }
 0x513   :  { %1058 = vmatpush3.msra.mxu1 %v1248_v12 }
 0x514   :  { %1059 = vmatprep.subr.mxu1 %v1151_v2 }
 0x515   :  { %1060 = vmatpush3.msra.mxu1 %v1257_v13 }
 0x516   :  { %1061 = vmatprep.subr.mxu1 %v1151_v2 }
 0x517   :  { %1062 = vmatpush3.msra.mxu1 %v1264_v14 }
 0x518   :  { %1063 = vmatprep.subr.mxu1 %v1151_v2 }
 0x519   :  { %1064 = vmatpush3.msra.mxu1 %v1271_v15 }
 0x51a   :  { %1065 = vmatprep.subr.mxu1 %v1151_v2 }
 0x51b   :  { %1066 = vmatpush3.msra.mxu1 %v1281_v16 }
 0x51c   :  { %1067 = vmatprep.subr.mxu1 %v1151_v2 }
 0x51d   :  { %1068 = vmatpush3.msra.mxu1 %v1290_v17 }
 0x51e   :  { %1069 = vmatprep.subr.mxu1 %v1151_v2 }
 0x51f   :  { %1070 = vmatpush3.msra.mxu1 %v1299_v18 }
 0x520   :  { %1071 = vmatprep.subr.mxu1 %v1151_v2 }
 0x521   :  { %1072 = vmatpush3.msra.mxu1 %v1308_v19 }
 0x522   :  { %1073 = vmatprep.subr.mxu1 %v1151_v2 }
 0x523   :  { %1074 = vmatpush3.msra.mxu1 %v1317_v20 }
 0x524   :  { %1075 = vmatprep.subr.mxu1 %v1151_v2 }
 0x525   :  { %1076 = vmatpush3.msra.mxu1 %v1326_v21 }
 0x5c6   :  { %v420_v52 = vpop.f32.mrf.mxu1 }
 0x5c7   :  { %v424_v53 = vmax.f32 %v420_v52, 1e-37 }
 0x5c8   :  { %v1009_v54 = vpop.f32.mrf.mxu1 }
 0x5c9   :  { %1133 = vlog2.f32 %v424_v53  ;;  %v638_v53 = vld [vmem:[%s1600_s0 + $0xf] sm:$0x1] }
 0x5d6   :  { %v1134_v58 = vpop.eup %1133 }
 0x5d7   :  { %v426_v59 = vmul.f32 0.6931472, %v1134_v58 }
 0x5d9   :  { %v427_v62 = vadd.f32 %v426_v59, %v350_v48 }
 0x5db   :  { %v433_v63 = vadd.f32 %v431_v61, %v427_v62 }
 0x5dd   :  { %v442_v0 = vsel %vm439_vm11, %v433_v63, %v345_v44 }
 0x5de   :  { %v445_v1 = vsel %vm43_vm1, %v442_v0, -inf }
 0x5df   :  { %446 = vmax.xlane.f32.xlu0 %v445_v1 }
 0x668   :  { %v447_v8 = vpop.xlane.xlu0 %446 }
 0x669   :  { %v448_v22 = vsub.f32 %v442_v0, %v447_v8 }
 0x66b   :  { %v449_v25 = vmul.f32 1.442695, %v448_v22 }
 0x66d   :  { %1135 = vpow2.f32 %v449_v25 }
 0x67a   :  { %v1136_v26 = vpop.eup %1135 }
 0x67b   :  { %1043 = vmatmul.mubr.f32.vlgmr.msra.gmra.mxu0 %v1136_v26 }
 0x67c   :  { %1081 = vmatpush3.msra.mxu0 %v1187_v3  ;;  %1112 = vmatprep.mubr.msk.f32.mxu0 %vm1152_vm2, %v1151_v2  ;;  %vm725_vm2 = vcmp.eq.s32.totalorder %v1345_v24, 7  ;;  %v721_v24 = vrot.slane %v638_v53, 7 }
 0x67d   :  { %1082 = vmatprep.subr.mxu0 %v1151_v2  ;;  %v726_v44 = vsel %vm725_vm2, %v1343_v23, 0.0 }
 0x67e   :  { %1083 = vmatpush3.msra.mxu0 %v1195_v5  ;;  %v727_v45 = vsel %vm144_vm3, %v726_v44, 0.0 }
 0x67f   :  { %1084 = vmatprep.subr.mxu0 %v1151_v2 }
 0x680   :  { %1085 = vmatpush3.msra.mxu0 %v1202_v6 }
 0x681   :  { %1086 = vmatprep.subr.mxu0 %v1151_v2 }
 0x682   :  { %1087 = vmatpush3.msra.mxu0 %v1217_v9  ;;  %v444_v9 = vld [vmem:[%s1600_s0 + $0xd] sm:$0x1] }
 0x683   :  { %1088 = vmatprep.subr.mxu0 %v1151_v2 }
 0x684   :  { %1089 = vmatpush3.msra.mxu0 %v1231_v10  ;;  %v527_v10 = vrot.slane %v444_v9, 7 }
 0x685   :  { %1090 = vmatprep.subr.mxu0 %v1151_v2 }
 0x686   :  { %1091 = vmatpush3.msra.mxu0 %v1239_v11  ;;  %v443_v11 = vld [vmem:[%s1600_s0 + $0x5] sm:$0x1] }
 0x687   :  { %1092 = vmatprep.subr.mxu0 %v1151_v2 }
 0x688   :  { %1093 = vmatpush3.msra.mxu0 %v1248_v12 }
 0x689   :  { %1094 = vmatprep.subr.mxu0 %v1151_v2 }
 0x68a   :  { %1095 = vmatpush3.msra.mxu0 %v1257_v13 }
 0x68b   :  { %1096 = vmatprep.subr.mxu0 %v1151_v2 }
 0x68c   :  { %1097 = vmatpush3.msra.mxu0 %v1264_v14  ;;  %v535_v14 = vpop.xlane.xlu1 %534 }
 0x68d   :  { %1098 = vmatprep.subr.mxu0 %v1151_v2  ;;  %vm536_vm13 = vcmp.gt.f32.partialorder %v535_v14, 0.0 }
 0x68e   :  { %1099 = vmatpush3.msra.mxu0 %v1271_v15 }
 0x68f   :  { %1100 = vmatprep.subr.mxu0 %v1151_v2 }
 0x690   :  { %1101 = vmatpush3.msra.mxu0 %v1281_v16 }
 0x691   :  { %1102 = vmatprep.subr.mxu0 %v1151_v2 }
 0x692   :  { %1103 = vmatpush3.msra.mxu0 %v1290_v17 }
 0x693   :  { %1104 = vmatprep.subr.mxu0 %v1151_v2 }
 0x694   :  { %1105 = vmatpush3.msra.mxu0 %v1299_v18 }
 0x695   :  { %1106 = vmatprep.subr.mxu0 %v1151_v2 }
 0x696   :  { %1107 = vmatpush3.msra.mxu0 %v1308_v19  ;;  %v629_v19 = vsel %vm628_vm14, %v1343_v23, 0.0  ;;  %v637_v23 = vld [vmem:[%s1600_s0 + $0x7] sm:$0x1] }
 0x697   :  { %1108 = vmatprep.subr.mxu0 %v1151_v2  ;;  %v722_v57 = vsel %vm40_vm0, %v721_v24, %v637_v23 }
 0x698   :  { %1109 = vmatpush3.msra.mxu0 %v1317_v20  ;;  %v630_v20 = vsel %vm144_vm3, %v629_v19, 0.0 }
 0x699   :  { %1110 = vmatprep.subr.mxu0 %v1151_v2  ;;  %v528_v2 = vsel %vm40_vm0, %v527_v10, %v443_v11  ;;  %631 = vadd.xlane.f32.xlu1 %v630_v20 }
 0x69a   :  { %1111 = vmatpush3.msra.mxu0 %v1326_v21 }
 0x69d   :  { %728 = vadd.xlane.f32.xlu1 %v727_v45 }
 0x722   :  { %v632_v38 = vpop.xlane.xlu1 %631 }
 0x723   :  { %vm633_vm15 = vcmp.gt.f32.partialorder %v632_v38, 0.0 }
 0x726   :  { %v729_v56 = vpop.xlane.xlu1 %728 }
 0x727   :  { %vm730_vm3 = vcmp.gt.f32.partialorder %v729_v56, 0.0 }
 0x73b   :  { %v517_v3 = vpop.f32.mrf.mxu0 }
 0x73c   :  { %v521_v5 = vmax.f32 %v517_v3, 1e-37 }
 0x73d   :  { %v1044_v6 = vpop.f32.mrf.mxu0 }
 0x73e   :  { %1137 = vlog2.f32 %v521_v5 }
 0x74b   :  { %v1138_v12 = vpop.eup %1137 }
 0x74c   :  { %v523_v13 = vmul.f32 0.6931472, %v1138_v12 }
 0x74e   :  { %v524_v15 = vadd.f32 %v523_v13, %v447_v8 }
 0x750   :  { %v530_v16 = vadd.f32 %v528_v2, %v524_v15 }
 0x752   :  { %v539_v17 = vsel %vm536_vm13, %v530_v16, %v442_v0 }
 0x753   :  { %v542_v18 = vsel %vm43_vm1, %v539_v17, -inf }
 0x754   :  { %543 = vmax.xlane.f32.xlu0 %v542_v18 }
 0x7dd   :  { %v544_v21 = vpop.xlane.xlu0 %543 }
 0x7de   :  { %v545_v27 = vsub.f32 %v539_v17, %v544_v21 }
 0x7e0   :  { %v546_v28 = vmul.f32 1.442695, %v545_v27 }
 0x7e2   :  { %1139 = vpow2.f32 %v546_v28 }
 0x7ef   :  { %v1140_v29 = vpop.eup %1139 }
 0x7f0   :  { %1078 = vmatmul.mubr.f32.vlgmr.msra.gmra.mxu1 %v1140_v29 }
 0x8b0   :  { %v614_v30 = vpop.f32.mrf.mxu1 }
 0x8b1   :  { %v618_v31 = vmax.f32 %v614_v30, 1e-37 }
 0x8b2   :  { %v1079_v32 = vpop.f32.mrf.mxu1 }
 0x8b3   :  { %1141 = vlog2.f32 %v618_v31 }
 0x8c0   :  { %v1142_v36 = vpop.eup %1141 }
 0x8c1   :  { %v620_v37 = vmul.f32 0.6931472, %v1142_v36 }
 0x8c3   :  { %v621_v40 = vadd.f32 %v620_v37, %v544_v21 }
 0x8c5   :  { %v627_v41 = vadd.f32 %v625_v39, %v621_v40 }
 0x8c7   :  { %v636_v42 = vsel %vm633_vm15, %v627_v41, %v539_v17 }
 0x8c8   :  { %v639_v43 = vsel %vm43_vm1, %v636_v42, -inf }
 0x8c9   :  { %640 = vmax.xlane.f32.xlu0 %v639_v43 }
 0x952   :  { %v641_v46 = vpop.xlane.xlu0 %640 }
 0x953   :  { %v642_v47 = vsub.f32 %v636_v42, %v641_v46 }
 0x955   :  { %v643_v48 = vmul.f32 1.442695, %v642_v47 }
 0x957   :  { %1143 = vpow2.f32 %v643_v48 }
 0x964   :  { %v1144_v49 = vpop.eup %1143 }
 0x965   :  { %1113 = vmatmul.mubr.f32.vlgmr.msra.gmra.mxu0 %v1144_v49 }
 0xa25   :  { %v711_v50 = vpop.f32.mrf.mxu0 }
 0xa26   :  { %v715_v51 = vmax.f32 %v711_v50, 1e-37 }
 0xa27   :  { %v1114_v52 = vpop.f32.mrf.mxu0 }
 0xa28   :  { %1145 = vlog2.f32 %v715_v51 }
 0xa35   :  { %v1146_v54 = vpop.eup %1145 }
 0xa36   :  { %v717_v55 = vmul.f32 0.6931472, %v1146_v54 }
 0xa38   :  { %v718_v58 = vadd.f32 %v717_v55, %v641_v46 }
 0xa3a   :  { %v724_v59 = vadd.f32 %v722_v57, %v718_v58 }
 0xa3c   :  { %v733_v60 = vsel %vm730_vm3, %v724_v59, %v636_v42 }
 0xa3d   :  { %v734_v61 = vsel %vm43_vm1, %v733_v60, -inf }
 0xa3e   :  { %735 = vmax.xlane.f32.xlu0 %v734_v61 }
 0xac7   :  { %v736_v62 = vpop.xlane.xlu0 %735 }
 0xac8   :  { %v737_v63 = vsub.f32 %v733_v60, %v736_v62 }
 0xaca   :  { %v738_v0 = vmul.f32 1.442695, %v737_v63 }
 0xacc   :  { %1147 = vpow2.f32 %v738_v0 }
 0xad9   :  { %v1148_v1 = vpop.eup %1147 }
 0xada   :  { %v740_v4 = vsel %vm43_vm1, %v1148_v1, 0.0 }
 0xadb   :  { %741 = vadd.xlane.f32.xlu1 %v740_v4 }
 0xb64   :  { %v742_v7 = vpop.xlane.xlu1 %741 }
 0xb65   :  { %1149 = vlog2.f32 %v742_v7 }
 0xb72   :  { %v1150_v8 = vpop.eup %1149 }
 0xb73   :  { %v744_v22 = vmul.f32 0.6931472, %v1150_v8 }
 0xb75   :  { %v745_v25 = vadd.f32 %v744_v22, %v736_v62 }
 0xb77   :  { %746 = vst [vmem:[%s1603_s3] sm:$0x3] %v745_v25 }

</bundles_post_ra>
